<compile_context>
chip_gen: v6e
topology: v6e:2x2x1
jax: 0.10.0
libtpu: 0.0.40
codegen_flags: <defaults>
</compile_context>

<pallas_src>
import functools
import itertools

import jax
import jax.numpy as jnp
import numpy as np
from jax.experimental import pallas as pl
from jax.experimental.pallas import tpu as pltpu


def _fibinet_bilinear_kernel(x_ref, wbig_ref, o_ref, *, F, E):
    # x_ref:    (Bt, F*E)   batch tile of all field embeddings, lane-dense.
    # wbig_ref: (F*E, P*E)  pair-ordered left-operand weights (VMEM-resident).
    # o_ref:    (Bt, P*E)   all pair outputs for this batch tile, lane-dense.
    x = x_ref[...]                                               # (Bt, F*E)

    # All per-field linears + pair replication in ONE MXU matmul:
    #   left[:, p*E:(p+1)*E] = x_i @ W_i^T   for pair p = (i, j).
    left = jnp.dot(x, wbig_ref[...], preferred_element_type=jnp.float32)

    # Right operand: for left field i the right fields are i+1 .. F-1, which is
    # the contiguous slice x[:, (i+1)*E : F*E].  One slab, one multiply, one
    # unmasked full-width store.
    right = jnp.concatenate(
        [x[:, (i + 1) * E:F * E] for i in range(F - 1)], axis=-1)  # (Bt, P*E)

    o_ref[...] = (left * right).astype(o_ref.dtype)


def _build_w_big(weights, filed_size, embedding_size, bilinear_type="each"):
    """Resident left-operand weight matrix, shape (F*E, P*E).

    Column block p (pair (i, j) in itertools.combinations order) holds the
    transposed linear weight for that pair at rows i*E:(i+1)*E, zeros elsewhere,
    so x_flat @ W_big yields the pair-ordered left operands in one matmul.
    """
    F, E = filed_size, embedding_size
    pairs = list(itertools.combinations(range(F), 2))
    P = len(pairs)
    dtype = jnp.result_type(weights)
    w_big = jnp.zeros((F * E, P * E), dtype=dtype)
    for p, (i, _) in enumerate(pairs):
        if bilinear_type == "each":          # weights: (F, E, E)
            w_t = weights[i].T
        elif bilinear_type == "all":         # weights: (E, E), shared
            w_t = weights.T
        elif bilinear_type == "interaction":  # weights: (P, E, E), per pair
            w_t = weights[p].T
        else:
            raise NotImplementedError(bilinear_type)
        w_big = w_big.at[i * E:(i + 1) * E, p * E:(p + 1) * E].set(w_t)
    return w_big


def _round_up(x, m):
    return ((x + m - 1) // m) * m


def bilinear_interaction(x, weights, *, bilinear_type="each",
                         block_b=1024, out_dtype=None):
    """x: (B, F, E); weights per bilinear_type (see _build_w_big). Returns (B, P, E)."""
    if x.ndim != 3:
        raise ValueError(
            "Unexpected inputs dimensions %d, expect to be 3 dimensions" % x.ndim)
    B, F, E = x.shape
    P = F * (F - 1) // 2
    out_dtype = x.dtype if out_dtype is None else out_dtype

    w_big = _build_w_big(weights, F, E, bilinear_type)   # (F*E, P*E)
    x2 = x.reshape(B, F * E)                             # free row-major reshape

    # Batch tile: multiple of 8 sublanes, default 1024 rows (near HBM roofline,
    # well within default scoped VMEM).  Clamp to ceil(B/2) so the batch grid
    # has >= 2 'parallel' steps whenever possible (v7x dual-TensorCore sharding).
    # No wrapper pad/slice: pl.cdiv grid + masked edge block inside Pallas.
    half = _round_up(pl.cdiv(B, 2), 8)
    bt = max(8, min(_round_up(block_b, 8), half))
    grid = pl.cdiv(B, bt)

    kernel = functools.partial(_fibinet_bilinear_kernel, F=F, E=E)

    out2 = pl.pallas_call(
        kernel,
        out_shape=jax.ShapeDtypeStruct((B, P * E), out_dtype),
        grid_spec=pltpu.PrefetchScalarGridSpec(
            num_scalar_prefetch=0,
            grid=(grid,),
            in_specs=[
                # batch tile of the flattened input slab
                pl.BlockSpec((bt, F * E), lambda b: (b, 0)),
                # full resident weight matrix, same block every step (no re-DMA)
                pl.BlockSpec((F * E, P * E), lambda b: (0, 0)),
            ],
            out_specs=pl.BlockSpec((bt, P * E), lambda b: (b, 0)),
        ),
        compiler_params=pltpu.CompilerParams(
            dimension_semantics=("parallel",)),
    )(x2, w_big)

    return out2.reshape(B, P, E)                         # free row-major reshape


def _reference(x, weights):
    """Pure-JAX reference mirroring the PyTorch forward (bilinear_type='each')."""
    outs = []
    F = x.shape[1]
    for i, j in itertools.combinations(range(F), 2):
        t = x[:, i, :] @ weights[i].T
        outs.append(t * x[:, j, :])
    return jnp.stack(outs, axis=1)


if __name__ == "__main__":
    # Small shapes consistent with the module: batch=128, filed_size=8, embedding_size=32.
    B, F, E = 128, 8, 32

    key = jax.random.PRNGKey(0)
    kx, kw = jax.random.split(key)
    x = jax.random.normal(kx, (B, F, E), dtype=jnp.float32)
    # Per-field nn.Linear(E, E, bias=False) weights, (F, E, E), Linear init scale.
    bound = 1.0 / np.sqrt(E)
    weights = jax.random.uniform(
        kw, (F, E, E), minval=-bound, maxval=bound, dtype=jnp.float32)

    out = bilinear_interaction(x, weights, bilinear_type="each")
    out = jax.block_until_ready(out)

    ref = _reference(x, weights)
    assert out.shape == (B, F * (F - 1) // 2, E), out.shape
    np.testing.assert_allclose(np.asarray(out), np.asarray(ref), rtol=5e-5, atol=5e-5)

    print("KERNEL_OK")
</pallas_src>

<mosaic_0001>
module attributes {stable_mosaic.version = 11 : i64} {
  func.func @_fibinet_bilinear_kernel(%arg0: i32, %arg1: memref<64x256xf32, #tpu.memory_space<vmem>>, %arg2: memref<256x896xf32, #tpu.memory_space<vmem>>, %arg3: memref<64x896xf32, #tpu.memory_space<vmem>>) attributes {dimension_semantics = [#tpu.dimension_semantics<parallel>], iteration_bounds = array<i64: 2>, scalar_prefetch = 0 : i64, scratch_operands = 0 : i64, tpu.core_type = #tpu.core_type<tc>, window_params = [{transform_indices = @transform_0, window_bounds = array<i64: 64, 256>}, {pipeline_mode = #tpu.pipeline_mode<synchronous>, transform_indices = @transform_1, window_bounds = array<i64: 256, 896>}, {transform_indices = @transform_2, window_bounds = array<i64: 64, 896>}]} {
    %c0 = arith.constant 0 : index
    %c0_0 = arith.constant 0 : index
    %0 = vector.load %arg1[%c0, %c0_0] : memref<64x256xf32, #tpu.memory_space<vmem>>, vector<64x256xf32>
    %c0_1 = arith.constant 0 : index
    %c0_2 = arith.constant 0 : index
    %1 = vector.load %arg2[%c0_1, %c0_2] : memref<256x896xf32, #tpu.memory_space<vmem>>, vector<256x896xf32>
    %cst = arith.constant dense<0.000000e+00> : vector<64x896xf32>
    %2 = tpu.matmul %0, %1, %cst {dimension_numbers = #tpu.dot_dimension_numbers<[1], [0], [0], [1], [0, 0, 1, 1], [], []>} : vector<64x256xf32>, vector<256x896xf32>, vector<64x896xf32> -> vector<64x896xf32>
    %3 = vector.extract_strided_slice %0 {offsets = [0, 32], sizes = [64, 224], strides = [1, 1]} : vector<64x256xf32> to vector<64x224xf32>
    %4 = vector.extract_strided_slice %0 {offsets = [0, 64], sizes = [64, 192], strides = [1, 1]} : vector<64x256xf32> to vector<64x192xf32>
    %5 = vector.extract_strided_slice %0 {offsets = [0, 96], sizes = [64, 160], strides = [1, 1]} : vector<64x256xf32> to vector<64x160xf32>
    %6 = vector.extract_strided_slice %0 {offsets = [0, 128], sizes = [64, 128], strides = [1, 1]} : vector<64x256xf32> to vector<64x128xf32>
    %7 = vector.extract_strided_slice %0 {offsets = [0, 160], sizes = [64, 96], strides = [1, 1]} : vector<64x256xf32> to vector<64x96xf32>
    %8 = vector.extract_strided_slice %0 {offsets = [0, 192], sizes = [64, 64], strides = [1, 1]} : vector<64x256xf32> to vector<64x64xf32>
    %9 = vector.extract_strided_slice %0 {offsets = [0, 224], sizes = [64, 32], strides = [1, 1]} : vector<64x256xf32> to vector<64x32xf32>
    %10 = tpu.concatenate %3, %4, %5, %6, %7, %8, %9 in 1 : vector<64x224xf32>, vector<64x192xf32>, vector<64x160xf32>, vector<64x128xf32>, vector<64x96xf32>, vector<64x64xf32>, vector<64x32xf32> -> vector<64x896xf32>
    %11 = arith.mulf %2, %10 : vector<64x896xf32>
    %c0_3 = arith.constant 0 : index
    %c0_4 = arith.constant 0 : index
    %12 = vector.load %arg3[%c0_3, %c0_4] : memref<64x896xf32, #tpu.memory_space<vmem>>, vector<64x896xf32>
    tpu.vector_store %arg3[%c0_3, %c0_4], %11 {strides = array<i32>} : memref<64x896xf32, #tpu.memory_space<vmem>>, vector<64x896xf32>,
    return
  }
  func.func @transform_0(%arg0: i32) -> (i32, i32) {
    %c0_i32 = arith.constant 0 : i32
    %c0_i32_0 = arith.constant 0 : i32
    return %arg0, %c0_i32 : i32, i32
  }
  func.func @transform_1(%arg0: i32) -> (i32, i32) {
    %c0_i32 = arith.constant 0 : i32
    %c0_i32_0 = arith.constant 0 : i32
    %c0_i32_1 = arith.constant 0 : i32
    return %c0_i32, %c0_i32_0 : i32, i32
  }
  func.func @transform_2(%arg0: i32) -> (i32, i32) {
    %c0_i32 = arith.constant 0 : i32
    %c0_i32_0 = arith.constant 0 : i32
    return %arg0, %c0_i32 : i32, i32
  }
}

</mosaic_0001>

<bundles_post_ra>
// kernel: tpu_custom_call.1
= control target key start
LH: loop header
LB: loop body
LE: loop exit
PB: predicated region body
PF: predicated region fallthrough
CT: control target
= control target key end

     0   :  { %7 = vsyncpa [#allocation3], 0  ;;  %s2312_s0 = inlined_call_operand.hbm [shape: f32[128,256], index: 0, kind: input, shape index: {}]   ;;  %s2313_s1 = inlined_call_operand.hbm [shape: f32[256,896], index: 1, kind: input, shape index: {}]   ;;  %s2314_s2 = inlined_call_operand.hbm [shape: f32[128,896], index: 2, kind: output, shape index: {}]  }
   0x1   :  { %9 = vsyncpa [#allocation3 + $0x1], 0 }
   0x2   :  { %10 = vsyncpa [#allocation6], 0 }
   0x3   :  { %11 = vsyncpa [#allocation4], 0 }
   0x4   :  { %13 = vsyncpa [#allocation4 + $0x1], 0  ;;  %s1604_s9 = smov 0   ;;  %s1606_s10 = smov 0  }
   0x5   :  { %s1608_s11 = smov 0   ;;  %s1610_s12 = smov 0  }
   0x6 LB: > { %s1625_s13 = sadd.s32 4294967295, %s1575_s12   ;;  %s1309_s14 = sadd.s32 4294967294, %s1575_s12   ;;  %s1575_s12 = sphi %s1610_s12, %s2347_s12   ;;  %s1571_s11 = sphi %s1608_s11, %s2346_s11   ;;  %s1567_s10 = sphi %s1606_s10, %s2345_s10   ;;  %s1563_s9 = sphi %s1604_s9, %s2344_s9  }
   0x7   : > { %p39_p0 = scmp.ne.s32.totalorder %s1567_s10, %s1563_s9  ;;  %p2315_p1 = scmp.eq.s32.totalorder %s1625_s13, 0 }
   0x8   : > { %p90_p3 = scmp.eq.s32.totalorder %s1309_s14, 1  ;;  %p1310_p5 = scmp.ge.s32.totalorder %s1575_s12, 1 }
   0x9   : > { %p1634_p4 = por %p2315_p1, %p39_p0  ;;  %p97_p7 = scmp.lt.s32.totalorder %s1575_s12, 3 }
   0xa   : > { %p1639_p6 = por %p90_p3, %p39_p0  ;;  %s1577_s18 = smov [#allocation5]  }
   0xb   : > { %s2320_s15 = scalar_select %p1634_p4, 1, 0 }
   0xc   : > { %s2321_s16 = scalar_select %p1639_p6, 1, 0 }
   0xd   : > { %p1644_p8 = pnand %p1310_p5, %p97_p7  ;;  %s109_s19 = sshll.u32 %s1577_s18, 4  ;;  %s110_s19 = int_to_ptr.vmem [resolvable:$true] %s109_s19 }
   0xe   : > { %s1658_s21 = sadd.s32 1, %s1575_s12   ;;  %s26_s22 = sadd.s32 1, %s1571_s11 }
   0xf   : > { %s2322_s17 = scalar_select %p1644_p8, 1, 0 }
  0x10   : > { %p1393_p9 = pneg %p1644_p8  ;;  %s23_s23 = ssub.s32 %s1575_s12, %s1658_s21 }
  0x11   : > { %s1464_s24 = scalar_lea.vmem %s110_s19, 28672  ;;  %p1472_p5 = scmp.lt.s32.totalorder %s110_s19, %s110_s19 }
  0x12   : > { %p1653_p11 = pnand %p1393_p9, %p2315_p1  ;;  %p1465_p13 = scmp.ne.s32.totalorder %s110_s19, %s1464_s24 }
  0x13   : > { %p1473_p7 = scmp.lt.s32.totalorder %s1464_s24, %s1464_s24 }
  0x14   : > { %p1455_p12 = pneg %p1653_p11 }
  0x15   : > { %p1474_p10 = por %p1473_p7, %p1472_p5 }
  0x16   : > { %p1467_p0 = pnand %p1465_p13, %p1455_p12 }
  0x18   : > { %p1468_p3 = pneg %p1467_p0 }
  0x1a   : > { %p1475_p2 = pnand %p1474_p10, %p1468_p3 }
  0x1c   : > { %1478 = shalt.err (!%p1475_p2)
}
  0x1d   : > { %s1578_s25 = smov 896   ;;  %s1579_s26 = smov 56  }
  0x1e   : > { %1396 = dma.hbm_to_vmem [thread:$0]  (!%p1653_p11), %s2313_s1, 28672, %s110_s19, [#allocation6], %s1578_s25, %s1578_s25, %s1579_s26  }
  0x1f   : > { %p24_p9 = scmp.eq.s32.totalorder %s23_s23, 0  ;;  %p33_p12 = scmp.ne.s32.totalorder %s1571_s11, %s1567_s10 }
  0x20   : > { %p34_p10 = scmp.eq.s32.totalorder %s1575_s12, 0  ;;  %p1406_p2 = scmp.lt.s32.totalorder %s1575_s12, 2 }
  0x21   : > { %s1675_s29 = scalar_select %p24_p9, %s1571_s11, %s26_s22  }
  0x22   : > { %p35_p13 = por %p34_p10, %p33_p12  ;;  %p2324_p0 = scmp.eq.s32.totalorder %s1625_s13, 1 }
  0x23   : > { %s123_s3 = sand.u32 1, %s1571_s11   ;;  %s1326_s4 = sshll.u32 %s1575_s12, 11 }
  0x24   : > { %p1679_p3 = por %p2324_p0, %p33_p12  ;;  %s1313_s5 = sshll.u32 %s123_s3, 7 }
  0x25   : > { %s1688_s8 = scalar_lea.hbm %s2312_s0, %s1326_s4  ;;  %s127_s14 = scalar_lea.vmem [#allocation2], %s1313_s5 }
  0x26   : > { %s2325_s30 = scalar_select %p1679_p3, 1, 0 }
  0x27   : > { %s135_s18 = sshll.u32 %s127_s14, 4  ;;  %p1690_p11 = pnand %p1406_p2, %p35_p13  ;;  %s1694_s18 = int_to_ptr.vmem [resolvable:$true] %s135_s18 }
  0x28   : > { %s1696_s20 = scalar_lea.sflag [#allocation3], %s123_s3  ;;  %s1479_s22 = scalar_lea.hbm %s1688_s8, 2048 }
  0x29   : > { %p1480_p5 = scmp.ne.s32.totalorder %s1688_s8, %s1479_s22  ;;  %p1481_p7 = pneg %p1690_p11 }
  0x2a   : > { %s1484_s25 = scalar_lea.hbm %s2312_s0, 4096  ;;  %p1485_p10 = scmp.lt.s32.totalorder %s1688_s8, %s2312_s0 }
  0x2b   : > { %p1482_p9 = pnand %p1481_p7, %p1480_p5  ;;  %p1486_p2 = scmp.lt.s32.totalorder %s1484_s25, %s1479_s22 }
  0x2d   : > { %p1483_p12 = pneg %p1482_p9  ;;  %p1487_p13 = por %p1486_p2, %p1485_p10 }
  0x2f   : > { %p1488_p0 = pnand %p1487_p13, %p1483_p12 }
  0x31   : > { %1491 = shalt.err (!%p1488_p0)
}
  0x32   : > { %s1492_s28 = scalar_lea.vmem %s1694_s18, 2048  ;;  %s1580_s3 = smov [#allocation2]  }
  0x33   : > { %p1493_p1 = scmp.ne.s32.totalorder %s1694_s18, %s1492_s28  ;;  %s1497_s4 = sshll.u32 %s1580_s3, 4  ;;  %s1498_s4 = int_to_ptr.vmem [resolvable:$false] %s1497_s4 }
  0x34   : > { %s1499_s5 = scalar_lea.vmem %s1498_s4, 4096  ;;  %p1500_p9 = scmp.lt.s32.totalorder %s1694_s18, %s1498_s4 }
  0x35   : > { %p1495_p6 = pnand %p1493_p1, %p1481_p7  ;;  %p1501_p3 = scmp.lt.s32.totalorder %s1499_s5, %s1492_s28 }
  0x37   : > { %p1496_p5 = pneg %p1495_p6  ;;  %p1502_p4 = por %p1501_p3, %p1500_p9 }
  0x39   : > { %p1503_p8 = pnand %p1502_p4, %p1496_p5 }
  0x3b   : > { %1506 = shalt.err (!%p1503_p8)
}
  0x3c   : > { %s1581_s6 = smov 256   ;;  %s1582_s7 = smov 16  }
  0x3d   : > { %1400 = dma.hbm_to_vmem [thread:$0]  (!%p1690_p11), %s1688_s8, 2048, %s1694_s18, %s1696_s20, %s1581_s6, %s1581_s6, %s1582_s7  }
  0x3e   : > { %p2327_p1 = scmp.ne.s32.totalorder %s2322_s17, 0 }
  0x40   : > { %147 = sbr.rel (%p2327_p1) target bundleno = 469 (0x1d5), region = 28 }
  0x45   : > { %s1720_s14 = sand.u32 1, %s1567_s10   ;;  %p2328_p4 = scmp.ne.s32.totalorder %s2320_s15, 0 }
  0x46   : > { %s1318_s22 = sshll.u32 %s1720_s14, 7  ;;  %s150_s23 = scalar_lea.sflag [#allocation3], %s1720_s14 }
  0x47   : > { %s1724_s24 = scalar_lea.vmem [#allocation2], %s1318_s22 }
  0x48   : > { %1550 = dma.done.wait (%p2328_p4), %s150_s23, 2048  }
  0x49   : > { %1552 = vsyncadd (%p2328_p4), %s150_s23, 4294965248  ;;  %p2329_p6 = scmp.eq.s32.totalorder %s1625_s13, 0 }
  0x4b   : > { %1554 = dma.done.wait (%p2329_p6), [#allocation6], 28672   ;;  %p2330_p8 = pmov %p2329_p6 }
  0x4c   : > { %v302_v0 = vld [vmem:[#allocation5 + $0x350] sm:$0xff]  ;;  %v304_v1 = vld [vmem:[#allocation5 + $0x360] sm:$0xff]  ;;  %v301_v2 = vld [vmem:[#allocation5 + $0x348] sm:$0xff]  ;;  %s1583_s15 = smov 96   ;;  %s1584_s17 = smov 32   ;;  %vm969_vm0 = vcmask 261120  }
  0x4d   : > { %1556 = vsyncadd (%p2330_p8), [#allocation6], 4294938624  ;;  %420 = vmatprep.subr.mxu0 %v302_v0  ;;  %533 = vmatprep.subr.mxu1 %v304_v1  ;;  %v303_v3 = vld [vmem:[#allocation5 + $0x358] sm:$0xff]  ;;  %v297_v5 = vld [vmem:[#allocation5 + $0x328] sm:$0xff]  ;;  %s1585_s8 = smov 64   ;;  %vm912_vm1 = vcmask 785408  }
  0x4e   : > { %v295_v4 = vld [vmem:[#allocation5 + $0x318] sm:$0xff]  ;;  %421 = vmatpush1.msra.mxu0 %v301_v2  ;;  %534 = vmatpush1.msra.mxu1 %v303_v3  ;;  %v294_v6 = vld [vmem:[#allocation5 + $0x310] sm:$0xff]  ;;  %v296_v7 = vld [vmem:[#allocation5 + $0x320] sm:$0xff]  ;;  %s1383_s18 = smul.u32 448, %s1720_s14  ;;  %vm1034_vm2 = vcmask 523264   ;;  %p2341_p11 = scmp.ne.s32.totalorder %s2325_s30, 0 }
  0x4f   : > { %v288_v8 = vld [vmem:[#allocation5 + $0x2e0] sm:$0xff]  ;;  %422 = vmatprep.subr.mxu0 %v295_v4  ;;  %535 = vmatprep.subr.mxu1 %v297_v5  ;;  %v290_v9 = vld [vmem:[#allocation5 + $0x2f0] sm:$0xff]  ;;  %v287_v10 = vld [vmem:[#allocation5 + $0x2d8] sm:$0xff]  ;;  %s1384_s20 = smul.u32 7168, %s1625_s13  ;;  %s1212_s13 = scalar_lea.sflag [#allocation4], %s1720_s14 }
  0x50   : > { %v289_v11 = vld [vmem:[#allocation5 + $0x2e8] sm:$0xff]  ;;  %423 = vmatpush1.msra.mxu0 %v294_v6  ;;  %536 = vmatpush1.msra.mxu1 %v296_v7  ;;  %v283_v13 = vld [vmem:[#allocation5 + $0x2b8] sm:$0xff]  ;;  %v280_v14 = vld [vmem:[#allocation5 + $0x2a0] sm:$0xff]  ;;  %s2030_s19 = scalar_lea.vmem [#allocation7], %s1383_s18  ;;  %s1586_s4 = smov [#allocation7]  }
  0x51   : > { %v281_v12 = vld [vmem:[#allocation5 + $0x2a8] sm:$0xff]  ;;  %424 = vmatprep.subr.mxu0 %v288_v8  ;;  %537 = vmatprep.subr.mxu1 %v290_v9  ;;  %v282_v15 = vld [vmem:[#allocation5 + $0x2b0] sm:$0xff]  ;;  %v276_v17 = vld [vmem:[#allocation5 + $0x280] sm:$0xff]  ;;  %s1226_s25 = sshll.u32 %s2030_s19, 4  ;;  %s2264_s28 = scalar_lea.hbm %s2314_s2, %s1384_s20  ;;  %s2266_s25 = int_to_ptr.vmem [resolvable:$true] %s1226_s25 }
  0x52   : > { %425 = vmatpush1.msra.mxu0 %v287_v10  ;;  %538 = vmatpush1.msra.mxu1 %v289_v11  ;;  %v274_v16 = vld [vmem:[#allocation5 + $0x270] sm:$0xff]  ;;  %v273_v18 = vld [vmem:[#allocation5 + $0x268] sm:$0xff]  ;;  %v275_v19 = vld [vmem:[#allocation5 + $0x278] sm:$0xff]  ;;  %s1507_s3 = scalar_lea.vmem %s2266_s25, 7168  ;;  %s1511_s5 = sshll.u32 %s1586_s4, 4  ;;  %s1512_s5 = int_to_ptr.vmem [resolvable:$false] %s1511_s5 }
  0x53   : > { %426 = vmatprep.subr.mxu0 %v281_v12  ;;  %539 = vmatprep.subr.mxu1 %v283_v13  ;;  %v267_v20 = vld [vmem:[#allocation5 + $0x238] sm:$0xff]  ;;  %v269_v21 = vld [vmem:[#allocation5 + $0x248] sm:$0xff]  ;;  %v266_v22 = vld [vmem:[#allocation5 + $0x230] sm:$0xff]  ;;  %p1508_p3 = scmp.ne.s32.totalorder %s2266_s25, %s1507_s3  ;;  %s1513_s6 = scalar_lea.vmem %s1512_s5, 14336 }
  0x54   : > { %427 = vmatpush1.msra.mxu0 %v280_v14  ;;  %540 = vmatpush1.msra.mxu1 %v282_v15  ;;  %v268_v23 = vld [vmem:[#allocation5 + $0x240] sm:$0xff]  ;;  %v262_v25 = vld [vmem:[#allocation5 + $0x210] sm:$0xff]  ;;  %v259_v26 = vld [vmem:[#allocation5 + $0x1f8] sm:$0xff]  ;;  %p1514_p10 = scmp.lt.s32.totalorder %s2266_s25, %s1512_s5  ;;  %p1515_p2 = scmp.lt.s32.totalorder %s1513_s6, %s1507_s3 }
  0x55   : > { %428 = vmatprep.subr.mxu0 %v274_v16  ;;  %541 = vmatprep.subr.mxu1 %v276_v17  ;;  %v260_v24 = vld [vmem:[#allocation5 + $0x200] sm:$0xff]  ;;  %v261_v27 = vld [vmem:[#allocation5 + $0x208] sm:$0xff]  ;;  %v255_v29 = vld [vmem:[#allocation5 + $0x1d8] sm:$0xff]  ;;  %p1509_p7 = pnand %p1508_p3, %p2341_p11 }
  0x56   : > { %429 = vmatpush1.msra.mxu0 %v273_v18  ;;  %542 = vmatpush1.msra.mxu1 %v275_v19  ;;  %v253_v28 = vld [vmem:[#allocation5 + $0x1c8] sm:$0xff]  ;;  %v252_v30 = vld [vmem:[#allocation5 + $0x1c0] sm:$0xff]  ;;  %v254_v31 = vld [vmem:[#allocation5 + $0x1d0] sm:$0xff]  ;;  %p1516_p13 = por %p1515_p2, %p1514_p10 }
  0x57   : > { %430 = vmatprep.subr.mxu0 %v267_v20  ;;  %543 = vmatprep.subr.mxu1 %v269_v21  ;;  %v246_v32 = vld [vmem:[#allocation5 + $0x190] sm:$0xff]  ;;  %v248_v33 = vld [vmem:[#allocation5 + $0x1a0] sm:$0xff]  ;;  %v245_v34 = vld [vmem:[#allocation5 + $0x188] sm:$0xff]  ;;  %p1510_p12 = pneg %p1509_p7 }
  0x58   : > { %431 = vmatpush1.msra.mxu0 %v266_v22  ;;  %544 = vmatpush1.msra.mxu1 %v268_v23  ;;  %v247_v35 = vld [vmem:[#allocation5 + $0x198] sm:$0xff]  ;;  %v241_v37 = vld [vmem:[#allocation5 + $0x168] sm:$0xff]  ;;  %v238_v38 = vld [vmem:[#allocation5 + $0x150] sm:$0xff] }
  0x59   : > { %432 = vmatprep.subr.mxu0 %v260_v24  ;;  %545 = vmatprep.subr.mxu1 %v262_v25  ;;  %v239_v36 = vld [vmem:[#allocation5 + $0x158] sm:$0xff]  ;;  %v240_v39 = vld [vmem:[#allocation5 + $0x160] sm:$0xff]  ;;  %v234_v41 = vld [vmem:[#allocation5 + $0x130] sm:$0xff]  ;;  %p1517_p0 = pnand %p1516_p13, %p1510_p12 }
  0x5a   : > { %433 = vmatpush1.msra.mxu0 %v259_v26  ;;  %546 = vmatpush1.msra.mxu1 %v261_v27  ;;  %v232_v40 = vld [vmem:[#allocation5 + $0x120] sm:$0xff]  ;;  %v231_v42 = vld [vmem:[#allocation5 + $0x118] sm:$0xff]  ;;  %v233_v43 = vld [vmem:[#allocation5 + $0x128] sm:$0xff] }
  0x5b   : > { %434 = vmatprep.subr.mxu0 %v253_v28  ;;  %547 = vmatprep.subr.mxu1 %v255_v29  ;;  %v225_v44 = vld [vmem:[#allocation5 + $0xe8] sm:$0xff]  ;;  %v227_v45 = vld [vmem:[#allocation5 + $0xf8] sm:$0xff]  ;;  %v224_v46 = vld [vmem:[#allocation5 + $0xe0] sm:$0xff] }
  0x5c   : > { %435 = vmatpush1.msra.mxu0 %v252_v30  ;;  %548 = vmatpush1.msra.mxu1 %v254_v31  ;;  %v226_v47 = vld [vmem:[#allocation5 + $0xf0] sm:$0xff]  ;;  %v220_v49 = vld [vmem:[#allocation5 + $0xc0] sm:$0xff]  ;;  %v217_v50 = vld [vmem:[#allocation5 + $0xa8] sm:$0xff] }
  0x5d   : > { %436 = vmatprep.subr.mxu0 %v246_v32  ;;  %549 = vmatprep.subr.mxu1 %v248_v33  ;;  %v218_v48 = vld [vmem:[#allocation5 + $0xb0] sm:$0xff]  ;;  %v219_v51 = vld [vmem:[#allocation5 + $0xb8] sm:$0xff]  ;;  %v213_v53 = vld [vmem:[#allocation5 + $0x88] sm:$0xff] }
  0x5e   : > { %437 = vmatpush1.msra.mxu0 %v245_v34  ;;  %550 = vmatpush1.msra.mxu1 %v247_v35  ;;  %v211_v52 = vld [vmem:[#allocation5 + $0x78] sm:$0xff]  ;;  %v210_v54 = vld [vmem:[#allocation5 + $0x70] sm:$0xff]  ;;  %v212_v55 = vld [vmem:[#allocation5 + $0x80] sm:$0xff] }
  0x5f   : > { %438 = vmatprep.subr.mxu0 %v239_v36  ;;  %551 = vmatprep.subr.mxu1 %v241_v37  ;;  %v204_v56 = vld [vmem:[#allocation5 + $0x40] sm:$0xff]  ;;  %v206_v57 = vld [vmem:[#allocation5 + $0x50] sm:$0xff]  ;;  %v203_v58 = vld [vmem:[#allocation5 + $0x38] sm:$0xff] }
  0x60   : > { %439 = vmatpush1.msra.mxu0 %v238_v38  ;;  %552 = vmatpush1.msra.mxu1 %v240_v39  ;;  %v205_v59 = vld [vmem:[#allocation5 + $0x48] sm:$0xff]  ;;  %v199_v61 = vld [vmem:[#allocation5 + $0x18] sm:$0xff]  ;;  %v196_v62 = vld [vmem:[#allocation5] sm:$0xff] }
  0x61   : > { %440 = vmatprep.subr.mxu0 %v232_v40  ;;  %553 = vmatprep.subr.mxu1 %v234_v41  ;;  %v197_v60 = vld [vmem:[#allocation5 + $0x8] sm:$0xff]  ;;  %v198_v63 = vld [vmem:[#allocation5 + $0x10] sm:$0xff]  ;;  %v416_v1 = vld [vmem:[#allocation5 + $0x6e0] sm:$0xff] }
  0x62   : > { %441 = vmatpush1.msra.mxu0 %v231_v42  ;;  %554 = vmatpush1.msra.mxu1 %v233_v43  ;;  %v414_v0 = vld [vmem:[#allocation5 + $0x6d0] sm:$0xff]  ;;  %v413_v2 = vld [vmem:[#allocation5 + $0x6c8] sm:$0xff]  ;;  %v415_v3 = vld [vmem:[#allocation5 + $0x6d8] sm:$0xff] }
  0x63   : > { %442 = vmatprep.subr.mxu0 %v225_v44  ;;  %555 = vmatprep.subr.mxu1 %v227_v45  ;;  %v407_v4 = vld [vmem:[#allocation5 + $0x698] sm:$0xff]  ;;  %v409_v5 = vld [vmem:[#allocation5 + $0x6a8] sm:$0xff]  ;;  %v406_v6 = vld [vmem:[#allocation5 + $0x690] sm:$0xff] }
  0x64   : > { %443 = vmatpush1.msra.mxu0 %v224_v46  ;;  %556 = vmatpush1.msra.mxu1 %v226_v47  ;;  %v408_v7 = vld [vmem:[#allocation5 + $0x6a0] sm:$0xff]  ;;  %v402_v9 = vld [vmem:[#allocation5 + $0x670] sm:$0xff]  ;;  %v399_v10 = vld [vmem:[#allocation5 + $0x658] sm:$0xff] }
  0x65   : > { %444 = vmatprep.subr.mxu0 %v218_v48  ;;  %557 = vmatprep.subr.mxu1 %v220_v49  ;;  %v400_v8 = vld [vmem:[#allocation5 + $0x660] sm:$0xff]  ;;  %v401_v11 = vld [vmem:[#allocation5 + $0x668] sm:$0xff]  ;;  %v395_v13 = vld [vmem:[#allocation5 + $0x638] sm:$0xff] }
  0x66   : > { %445 = vmatpush1.msra.mxu0 %v217_v50  ;;  %558 = vmatpush1.msra.mxu1 %v219_v51  ;;  %v393_v12 = vld [vmem:[#allocation5 + $0x628] sm:$0xff]  ;;  %v392_v14 = vld [vmem:[#allocation5 + $0x620] sm:$0xff]  ;;  %v394_v15 = vld [vmem:[#allocation5 + $0x630] sm:$0xff] }
  0x67   : > { %446 = vmatprep.subr.mxu0 %v211_v52  ;;  %559 = vmatprep.subr.mxu1 %v213_v53  ;;  %v386_v16 = vld [vmem:[#allocation5 + $0x5f0] sm:$0xff]  ;;  %v388_v17 = vld [vmem:[#allocation5 + $0x600] sm:$0xff]  ;;  %v385_v18 = vld [vmem:[#allocation5 + $0x5e8] sm:$0xff] }
  0x68   : > { %447 = vmatpush1.msra.mxu0 %v210_v54  ;;  %560 = vmatpush1.msra.mxu1 %v212_v55  ;;  %v387_v19 = vld [vmem:[#allocation5 + $0x5f8] sm:$0xff]  ;;  %v381_v21 = vld [vmem:[#allocation5 + $0x5c8] sm:$0xff]  ;;  %v378_v22 = vld [vmem:[#allocation5 + $0x5b0] sm:$0xff] }
  0x69   : > { %448 = vmatprep.subr.mxu0 %v204_v56  ;;  %561 = vmatprep.subr.mxu1 %v206_v57  ;;  %v379_v20 = vld [vmem:[#allocation5 + $0x5b8] sm:$0xff]  ;;  %v380_v23 = vld [vmem:[#allocation5 + $0x5c0] sm:$0xff]  ;;  %v374_v25 = vld [vmem:[#allocation5 + $0x590] sm:$0xff] }
  0x6a   : > { %449 = vmatpush1.msra.mxu0 %v203_v58  ;;  %562 = vmatpush1.msra.mxu1 %v205_v59  ;;  %v372_v24 = vld [vmem:[#allocation5 + $0x580] sm:$0xff]  ;;  %v371_v26 = vld [vmem:[#allocation5 + $0x578] sm:$0xff]  ;;  %v373_v27 = vld [vmem:[#allocation5 + $0x588] sm:$0xff] }
  0x6b   : > { %450 = vmatprep.subr.mxu0 %v197_v60  ;;  %563 = vmatprep.subr.mxu1 %v199_v61  ;;  %v365_v28 = vld [vmem:[#allocation5 + $0x548] sm:$0xff]  ;;  %v367_v29 = vld [vmem:[#allocation5 + $0x558] sm:$0xff]  ;;  %v364_v30 = vld [vmem:[#allocation5 + $0x540] sm:$0xff] }
  0x6c   : > { %451 = vmatpush1.msra.mxu0 %v196_v62  ;;  %564 = vmatpush1.msra.mxu1 %v198_v63  ;;  %v366_v31 = vld [vmem:[#allocation5 + $0x550] sm:$0xff]  ;;  %v360_v33 = vld [vmem:[#allocation5 + $0x520] sm:$0xff]  ;;  %v357_v34 = vld [vmem:[#allocation5 + $0x508] sm:$0xff] }
  0x6d   : > { %452 = vmatprep.subr.mxu0 %v414_v0  ;;  %565 = vmatprep.subr.mxu1 %v416_v1  ;;  %v358_v32 = vld [vmem:[#allocation5 + $0x510] sm:$0xff]  ;;  %v359_v35 = vld [vmem:[#allocation5 + $0x518] sm:$0xff]  ;;  %v353_v37 = vld [vmem:[#allocation5 + $0x4e8] sm:$0xff] }
  0x6e   : > { %453 = vmatpush2.msra.mxu0 %v413_v2  ;;  %566 = vmatpush2.msra.mxu1 %v415_v3  ;;  %v351_v36 = vld [vmem:[#allocation5 + $0x4d8] sm:$0xff]  ;;  %v350_v38 = vld [vmem:[#allocation5 + $0x4d0] sm:$0xff]  ;;  %v352_v39 = vld [vmem:[#allocation5 + $0x4e0] sm:$0xff] }
  0x6f   : > { %454 = vmatprep.subr.mxu0 %v407_v4  ;;  %567 = vmatprep.subr.mxu1 %v409_v5  ;;  %v344_v40 = vld [vmem:[#allocation5 + $0x4a0] sm:$0xff]  ;;  %v346_v41 = vld [vmem:[#allocation5 + $0x4b0] sm:$0xff]  ;;  %v343_v42 = vld [vmem:[#allocation5 + $0x498] sm:$0xff] }
  0x70   : > { %455 = vmatpush2.msra.mxu0 %v406_v6  ;;  %568 = vmatpush2.msra.mxu1 %v408_v7  ;;  %v345_v43 = vld [vmem:[#allocation5 + $0x4a8] sm:$0xff]  ;;  %v339_v45 = vld [vmem:[#allocation5 + $0x478] sm:$0xff]  ;;  %v336_v46 = vld [vmem:[#allocation5 + $0x460] sm:$0xff] }
  0x71   : > { %456 = vmatprep.subr.mxu0 %v400_v8  ;;  %569 = vmatprep.subr.mxu1 %v402_v9  ;;  %v337_v44 = vld [vmem:[#allocation5 + $0x468] sm:$0xff]  ;;  %v338_v47 = vld [vmem:[#allocation5 + $0x470] sm:$0xff]  ;;  %v332_v49 = vld [vmem:[#allocation5 + $0x440] sm:$0xff] }
  0x72   : > { %457 = vmatpush2.msra.mxu0 %v399_v10  ;;  %570 = vmatpush2.msra.mxu1 %v401_v11  ;;  %v330_v48 = vld [vmem:[#allocation5 + $0x430] sm:$0xff]  ;;  %v329_v50 = vld [vmem:[#allocation5 + $0x428] sm:$0xff]  ;;  %v331_v51 = vld [vmem:[#allocation5 + $0x438] sm:$0xff] }
  0x73   : > { %458 = vmatprep.subr.mxu0 %v393_v12  ;;  %571 = vmatprep.subr.mxu1 %v395_v13  ;;  %v323_v52 = vld [vmem:[#allocation5 + $0x3f8] sm:$0xff]  ;;  %v325_v53 = vld [vmem:[#allocation5 + $0x408] sm:$0xff]  ;;  %v322_v54 = vld [vmem:[#allocation5 + $0x3f0] sm:$0xff] }
  0x74   : > { %459 = vmatpush2.msra.mxu0 %v392_v14  ;;  %572 = vmatpush2.msra.mxu1 %v394_v15  ;;  %v324_v55 = vld [vmem:[#allocation5 + $0x400] sm:$0xff]  ;;  %v318_v57 = vld [vmem:[#allocation5 + $0x3d0] sm:$0xff]  ;;  %v315_v58 = vld [vmem:[#allocation5 + $0x3b8] sm:$0xff] }
  0x75   : > { %460 = vmatprep.subr.mxu0 %v386_v16  ;;  %573 = vmatprep.subr.mxu1 %v388_v17  ;;  %v316_v56 = vld [vmem:[#allocation5 + $0x3c0] sm:$0xff]  ;;  %v317_v59 = vld [vmem:[#allocation5 + $0x3c8] sm:$0xff]  ;;  %v311_v61 = vld [vmem:[#allocation5 + $0x398] sm:$0xff] }
  0x76   : > { %461 = vmatpush2.msra.mxu0 %v385_v18  ;;  %574 = vmatpush2.msra.mxu1 %v387_v19  ;;  %v309_v60 = vld [vmem:[#allocation5 + $0x388] sm:$0xff]  ;;  %v308_v62 = vld [vmem:[#allocation5 + $0x380] sm:$0xff]  ;;  %v310_v0 = vld [vmem:[#allocation5 + $0x390] sm:$0xff] }
  0x77   : > { %462 = vmatprep.subr.mxu0 %v379_v20  ;;  %575 = vmatprep.subr.mxu1 %v381_v21  ;;  %v1735_v63 = vld [vmem:[%s1724_s24 + $0x8] sm:$0xff]  ;;  %v1738_v1 = vld [vmem:[%s1724_s24] sm:$0xff]  ;;  %v306_v2 = vld [vmem:[#allocation5 + $0x370] sm:$0xff] }
  0x78   : > { %463 = vmatpush2.msra.mxu0 %v378_v22  ;;  %576 = vmatpush2.msra.mxu1 %v380_v23  ;;  %v419_v3 = vld [vmem:[#allocation5 + $0x6f8] sm:$0xff]  ;;  %v305_v4 = vld [vmem:[#allocation5 + $0x368] sm:$0xff]  ;;  %v412_v7 = vld [vmem:[#allocation5 + $0x6c0] sm:$0xff] }
  0x79   : > { %464 = vmatprep.subr.mxu0 %v372_v24  ;;  %577 = vmatprep.subr.mxu1 %v374_v25  ;;  %v307_v5 = vld [vmem:[#allocation5 + $0x378] sm:$0xff]  ;;  %v1745_v8 = vld [vmem:[%s1724_s24 + $0x10] sm:$0xff]  ;;  %v300_v11 = vld [vmem:[#allocation5 + $0x340] sm:$0xff] }
  0x7a   : > { %465 = vmatpush2.msra.mxu0 %v371_v26  ;;  %578 = vmatpush2.msra.mxu1 %v373_v27  ;;  %v299_v6 = vld [vmem:[#allocation5 + $0x338] sm:$0xff]  ;;  %v298_v10 = vld [vmem:[#allocation5 + $0x330] sm:$0xff]  ;;  %v292_v12 = vld [vmem:[#allocation5 + $0x300] sm:$0xff] }
  0x7b   : > { %466 = vmatprep.subr.mxu0 %v365_v28  ;;  %579 = vmatprep.subr.mxu1 %v367_v29  ;;  %v1748_v9 = vld [vmem:[%s1724_s24 + $0x18] sm:$0xff]  ;;  %v405_v13 = vld [vmem:[#allocation5 + $0x688] sm:$0xff]  ;;  %v398_v17 = vld [vmem:[#allocation5 + $0x650] sm:$0xff] }
  0x7c   : > { %467 = vmatpush2.msra.mxu0 %v364_v30  ;;  %580 = vmatpush2.msra.mxu1 %v366_v31  ;;  %v291_v14 = vld [vmem:[#allocation5 + $0x2f8] sm:$0xff]  ;;  %v293_v15 = vld [vmem:[#allocation5 + $0x308] sm:$0xff]  ;;  %v284_v19 = vld [vmem:[#allocation5 + $0x2c0] sm:$0xff] }
  0x7d   : > { %468 = vmatprep.subr.mxu0 %v358_v32  ;;  %581 = vmatprep.subr.mxu1 %v360_v33  ;;  %v285_v16 = vld [vmem:[#allocation5 + $0x2c8] sm:$0xff]  ;;  %v286_v20 = vld [vmem:[#allocation5 + $0x2d0] sm:$0xff]  ;;  %v1766_v21 = vld [vmem:[%s1724_s24 + $0x20] sm:$0xff] }
  0x7e   : > { %469 = vmatpush2.msra.mxu0 %v357_v34  ;;  %582 = vmatpush2.msra.mxu1 %v359_v35  ;;  %v1759_v18 = vld [vmem:[%s1724_s24 + $0x28] sm:$0xff]  ;;  %v278_v22 = vld [vmem:[#allocation5 + $0x290] sm:$0xff]  ;;  %v391_v23 = vld [vmem:[#allocation5 + $0x618] sm:$0xff] }
  0x7f   : > { %470 = vmatprep.subr.mxu0 %v351_v36  ;;  %583 = vmatprep.subr.mxu1 %v353_v37  ;;  %v277_v24 = vld [vmem:[#allocation5 + $0x288] sm:$0xff]  ;;  %v279_v25 = vld [vmem:[#allocation5 + $0x298] sm:$0xff]  ;;  %v384_v27 = vld [vmem:[#allocation5 + $0x5e0] sm:$0xff] }
  0x80   : > { %471 = vmatpush2.msra.mxu0 %v350_v38  ;;  %584 = vmatpush2.msra.mxu1 %v352_v39  ;;  %v271_v26 = vld [vmem:[#allocation5 + $0x258] sm:$0xff]  ;;  %v270_v29 = vld [vmem:[#allocation5 + $0x250] sm:$0xff]  ;;  %v272_v30 = vld [vmem:[#allocation5 + $0x260] sm:$0xff] }
  0x81   : > { %472 = vmatprep.subr.mxu0 %v344_v40  ;;  %585 = vmatprep.subr.mxu1 %v346_v41  ;;  %v1773_v28 = vld [vmem:[%s1724_s24 + $0x38] sm:$0xff]  ;;  %v1780_v31 = vld [vmem:[%s1724_s24 + $0x30] sm:$0xff]  ;;  %v264_v32 = vld [vmem:[#allocation5 + $0x220] sm:$0xff] }
  0x82   : > { %473 = vmatpush2.msra.mxu0 %v343_v42  ;;  %586 = vmatpush2.msra.mxu1 %v345_v43  ;;  %v377_v33 = vld [vmem:[#allocation5 + $0x5a8] sm:$0xff]  ;;  %v263_v34 = vld [vmem:[#allocation5 + $0x218] sm:$0xff]  ;;  %v370_v37 = vld [vmem:[#allocation5 + $0x570] sm:$0xff] }
  0x83   : > { %474 = vmatprep.subr.mxu0 %v337_v44  ;;  %587 = vmatprep.subr.mxu1 %v339_v45  ;;  %v265_v35 = vld [vmem:[#allocation5 + $0x228] sm:$0xff]  ;;  %v256_v39 = vld [vmem:[#allocation5 + $0x1e0] sm:$0xff]  ;;  %v258_v40 = vld [vmem:[#allocation5 + $0x1f0] sm:$0xff] }
  0x84   : > { %475 = vmatpush2.msra.mxu0 %v336_v46  ;;  %588 = vmatpush2.msra.mxu1 %v338_v47  ;;  %v257_v36 = vld [vmem:[#allocation5 + $0x1e8] sm:$0xff]  ;;  %v1794_v41 = vld [vmem:[%s1724_s24 + $0x40] sm:$0xff]  ;;  %v250_v42 = vld [vmem:[#allocation5 + $0x1b0] sm:$0xff] }
  0x85   : > { %476 = vmatprep.subr.mxu0 %v330_v48  ;;  %589 = vmatprep.subr.mxu1 %v332_v49  ;;  %v1787_v38 = vld [vmem:[%s1724_s24 + $0x48] sm:$0xff]  ;;  %v363_v43 = vld [vmem:[#allocation5 + $0x538] sm:$0xff]  ;;  %v356_v47 = vld [vmem:[#allocation5 + $0x500] sm:$0xff] }
  0x86   : > { %477 = vmatpush2.msra.mxu0 %v329_v50  ;;  %590 = vmatpush2.msra.mxu1 %v331_v51  ;;  %v249_v44 = vld [vmem:[#allocation5 + $0x1a8] sm:$0xff]  ;;  %v251_v45 = vld [vmem:[#allocation5 + $0x1b8] sm:$0xff]  ;;  %v242_v49 = vld [vmem:[#allocation5 + $0x170] sm:$0xff] }
  0x87   : > { %478 = vmatprep.subr.mxu0 %v323_v52  ;;  %591 = vmatprep.subr.mxu1 %v325_v53  ;;  %v243_v46 = vld [vmem:[#allocation5 + $0x178] sm:$0xff]  ;;  %v244_v50 = vld [vmem:[#allocation5 + $0x180] sm:$0xff]  ;;  %v1808_v51 = vld [vmem:[%s1724_s24 + $0x50] sm:$0xff] }
  0x88   : > { %479 = vmatpush2.msra.mxu0 %v322_v54  ;;  %592 = vmatpush2.msra.mxu1 %v324_v55  ;;  %v1801_v48 = vld [vmem:[%s1724_s24 + $0x58] sm:$0xff]  ;;  %v236_v52 = vld [vmem:[#allocation5 + $0x140] sm:$0xff]  ;;  %v349_v53 = vld [vmem:[#allocation5 + $0x4c8] sm:$0xff] }
  0x89   : > { %480 = vmatprep.subr.mxu0 %v316_v56  ;;  %593 = vmatprep.subr.mxu1 %v318_v57  ;;  %v235_v54 = vld [vmem:[#allocation5 + $0x138] sm:$0xff]  ;;  %v237_v55 = vld [vmem:[#allocation5 + $0x148] sm:$0xff]  ;;  %v342_v57 = vld [vmem:[#allocation5 + $0x490] sm:$0xff] }
  0x8a   : > { %481 = vmatpush2.msra.mxu0 %v315_v58  ;;  %594 = vmatpush2.msra.mxu1 %v317_v59  ;;  %v229_v56 = vld [vmem:[#allocation5 + $0x108] sm:$0xff]  ;;  %v228_v59 = vld [vmem:[#allocation5 + $0x100] sm:$0xff] }
  0x8b   : > { %482 = vmatprep.subr.mxu0 %v309_v60  ;;  %595 = vmatprep.subr.mxu1 %v311_v61  ;;  %v1815_v58 = vld [vmem:[%s1724_s24 + $0x68] sm:$0xff]  ;;  %v230_v60 = vld [vmem:[#allocation5 + $0x110] sm:$0xff]  ;;  %v1822_v61 = vld [vmem:[%s1724_s24 + $0x60] sm:$0xff] }
  0x8c   : > { %483 = vmatpush2.msra.mxu0 %v308_v62  ;;  %484 = vmatprep.mubr.f32.mxu0 %v1735_v63  ;;  %v222_v62 = vld [vmem:[#allocation5 + $0xd0] sm:$0xff] }
  0x8d   : > { %596 = vmatpush2.msra.mxu1 %v310_v0  ;;  %597 = vmatprep.mubr.f32.mxu1 %v1735_v63  ;;  %v335_v0 = vld [vmem:[#allocation5 + $0x458] sm:$0xff] }
  0x8e   : > { %485 = vmatmul.mubr.f32.vlgmr.msra.gmra.mxu0 %v1738_v1  ;;  %598 = vmatmul.mubr.f32.vlgmr.msra.gmra.mxu1 %v1738_v1 }
  0x8f   : > { %646 = vmatprep.subr.mxu0 %v306_v2  ;;  %1327 = vmatprep.subr.mxu1 %v419_v3  ;;  %v221_v2 = vld [vmem:[#allocation5 + $0xc8] sm:$0xff]  ;;  %v223_v3 = vld [vmem:[#allocation5 + $0xd8] sm:$0xff] }
  0x90   : > { %647 = vmatpush1.msra.mxu0 %v305_v4  ;;  %1328 = vmatpush3.msra.mxu1 %v307_v5  ;;  %v215_v4 = vld [vmem:[#allocation5 + $0x98] sm:$0xff]  ;;  %v328_v5 = vld [vmem:[#allocation5 + $0x420] sm:$0xff] }
  0x91   : > { %648 = vmatprep.subr.mxu0 %v299_v6  ;;  %1329 = vmatprep.subr.mxu1 %v412_v7  ;;  %v1829_v6 = vld [vmem:[%s1724_s24 + $0x78] sm:$0xff]  ;;  %v214_v7 = vld [vmem:[#allocation5 + $0x90] sm:$0xff] }
  0x92   : > { %884 = vrot.lane.b32.xlu1 %v1745_v8, %s1583_s15  ;;  %880 = vrot.lane.b32.xlu0 %v1738_v1, %s1583_s15 }
  0x93   : > { %490 = vmatprep.mubr.f32.mxu0 %v1748_v9  ;;  %603 = vmatprep.mubr.f32.mxu1 %v1748_v9 }
  0x94   : > { %649 = vmatpush1.msra.mxu0 %v298_v10  ;;  %1330 = vmatpush3.msra.mxu1 %v300_v11  ;;  %v216_v10 = vld [vmem:[#allocation5 + $0xa0] sm:$0xff]  ;;  %v1836_v11 = vld [vmem:[%s1724_s24 + $0x70] sm:$0xff] }
  0x95   : > { %491 = vmatmul.mubr.f32.gmra.mxu0 %v1745_v8  ;;  %604 = vmatmul.mubr.f32.gmra.mxu1 %v1745_v8 }
  0x96   : > { %650 = vmatprep.subr.mxu0 %v292_v12  ;;  %1331 = vmatprep.subr.mxu1 %v405_v13  ;;  %v208_v12 = vld [vmem:[#allocation5 + $0x60] sm:$0xff]  ;;  %v321_v13 = vld [vmem:[#allocation5 + $0x3e8] sm:$0xff] }
  0x97   : > { %651 = vmatpush1.msra.mxu0 %v291_v14  ;;  %1332 = vmatpush3.msra.mxu1 %v293_v15  ;;  %v207_v14 = vld [vmem:[#allocation5 + $0x58] sm:$0xff]  ;;  %v209_v15 = vld [vmem:[#allocation5 + $0x68] sm:$0xff] }
  0x98   : > { %652 = vmatprep.subr.mxu0 %v285_v16  ;;  %1333 = vmatprep.subr.mxu1 %v398_v17  ;;  %v201_v16 = vld [vmem:[#allocation5 + $0x28] sm:$0xff]  ;;  %v314_v17 = vld [vmem:[#allocation5 + $0x3b0] sm:$0xff] }
  0x99   : > { %886 = vrot.lane.b32.xlu1 %v1748_v9, %s1583_s15  ;;  %882 = vrot.lane.b32.xlu0 %v1735_v63, %s1583_s15 }
  0x9a   : > { %496 = vmatprep.mubr.f32.mxu0 %v1759_v18  ;;  %609 = vmatprep.mubr.f32.mxu1 %v1759_v18 }
  0x9b   : > { %653 = vmatpush1.msra.mxu0 %v284_v19  ;;  %1334 = vmatpush3.msra.mxu1 %v286_v20  ;;  %v200_v19 = vld [vmem:[#allocation5 + $0x20] sm:$0xff]  ;;  %v202_v20 = vld [vmem:[#allocation5 + $0x30] sm:$0xff] }
  0x9c   : > { %497 = vmatmul.mubr.f32.gmra.mxu0 %v1766_v21  ;;  %610 = vmatmul.mubr.f32.gmra.mxu1 %v1766_v21 }
  0x9d   : > { %654 = vmatprep.subr.mxu0 %v278_v22  ;;  %1335 = vmatprep.subr.mxu1 %v391_v23  ;;  %v418_v22 = vld [vmem:[#allocation5 + $0x6f0] sm:$0xff]  ;;  %v417_v23 = vld [vmem:[#allocation5 + $0x6e8] sm:$0xff] }
  0x9e   : > { %655 = vmatpush1.msra.mxu0 %v277_v24  ;;  %1336 = vmatpush3.msra.mxu1 %v279_v25  ;;  %v411_v24 = vld [vmem:[#allocation5 + $0x6b8] sm:$0xff]  ;;  %v410_v25 = vld [vmem:[#allocation5 + $0x6b0] sm:$0xff] }
  0x9f   : > { %656 = vmatprep.subr.mxu0 %v271_v26  ;;  %1337 = vmatprep.subr.mxu1 %v384_v27  ;;  %v404_v26 = vld [vmem:[#allocation5 + $0x680] sm:$0xff]  ;;  %v403_v27 = vld [vmem:[#allocation5 + $0x678] sm:$0xff] }
  0xa0   : > { %890 = vrot.lane.b32.xlu1 %v1759_v18, %s1583_s15  ;;  %888 = vrot.lane.b32.xlu0 %v1766_v21, %s1583_s15 }
  0xa1   : > { %502 = vmatprep.mubr.f32.mxu0 %v1773_v28  ;;  %615 = vmatprep.mubr.f32.mxu1 %v1773_v28 }
  0xa2   : > { %657 = vmatpush1.msra.mxu0 %v270_v29  ;;  %1338 = vmatpush3.msra.mxu1 %v272_v30  ;;  %v397_v29 = vld [vmem:[#allocation5 + $0x648] sm:$0xff]  ;;  %v396_v30 = vld [vmem:[#allocation5 + $0x640] sm:$0xff] }
  0xa3   : > { %503 = vmatmul.mubr.f32.gmra.mxu0 %v1780_v31  ;;  %616 = vmatmul.mubr.f32.gmra.mxu1 %v1780_v31 }
  0xa4   : > { %658 = vmatprep.subr.mxu0 %v264_v32  ;;  %1339 = vmatprep.subr.mxu1 %v377_v33  ;;  %v390_v32 = vld [vmem:[#allocation5 + $0x610] sm:$0xff]  ;;  %v389_v33 = vld [vmem:[#allocation5 + $0x608] sm:$0xff] }
  0xa5   : > { %659 = vmatpush1.msra.mxu0 %v263_v34  ;;  %1340 = vmatpush3.msra.mxu1 %v265_v35  ;;  %v383_v34 = vld [vmem:[#allocation5 + $0x5d8] sm:$0xff]  ;;  %v382_v35 = vld [vmem:[#allocation5 + $0x5d0] sm:$0xff] }
  0xa6   : > { %660 = vmatprep.subr.mxu0 %v257_v36  ;;  %1341 = vmatprep.subr.mxu1 %v370_v37  ;;  %v376_v36 = vld [vmem:[#allocation5 + $0x5a0] sm:$0xff]  ;;  %v375_v37 = vld [vmem:[#allocation5 + $0x598] sm:$0xff] }
  0xa7   : > { %894 = vrot.lane.b32.xlu1 %v1773_v28, %s1583_s15  ;;  %892 = vrot.lane.b32.xlu0 %v1780_v31, %s1583_s15 }
  0xa8   : > { %508 = vmatprep.mubr.f32.mxu0 %v1787_v38  ;;  %621 = vmatprep.mubr.f32.mxu1 %v1787_v38 }
  0xa9   : > { %661 = vmatpush1.msra.mxu0 %v256_v39  ;;  %1342 = vmatpush3.msra.mxu1 %v258_v40  ;;  %v369_v39 = vld [vmem:[#allocation5 + $0x568] sm:$0xff]  ;;  %v368_v40 = vld [vmem:[#allocation5 + $0x560] sm:$0xff] }
  0xaa   : > { %509 = vmatmul.mubr.f32.gmra.mxu0 %v1794_v41  ;;  %622 = vmatmul.mubr.f32.gmra.mxu1 %v1794_v41 }
  0xab   : > { %662 = vmatprep.subr.mxu0 %v250_v42  ;;  %1343 = vmatprep.subr.mxu1 %v363_v43  ;;  %v362_v42 = vld [vmem:[#allocation5 + $0x530] sm:$0xff]  ;;  %v361_v43 = vld [vmem:[#allocation5 + $0x528] sm:$0xff] }
  0xac   : > { %663 = vmatpush1.msra.mxu0 %v249_v44  ;;  %1344 = vmatpush3.msra.mxu1 %v251_v45  ;;  %v355_v44 = vld [vmem:[#allocation5 + $0x4f8] sm:$0xff]  ;;  %v354_v45 = vld [vmem:[#allocation5 + $0x4f0] sm:$0xff] }
  0xad   : > { %664 = vmatprep.subr.mxu0 %v243_v46  ;;  %1345 = vmatprep.subr.mxu1 %v356_v47  ;;  %v348_v46 = vld [vmem:[#allocation5 + $0x4c0] sm:$0xff]  ;;  %v347_v47 = vld [vmem:[#allocation5 + $0x4b8] sm:$0xff] }
  0xae   : > { %898 = vrot.lane.b32.xlu1 %v1787_v38, %s1583_s15  ;;  %896 = vrot.lane.b32.xlu0 %v1794_v41, %s1583_s15 }
  0xaf   : > { %514 = vmatprep.mubr.f32.mxu0 %v1801_v48  ;;  %627 = vmatprep.mubr.f32.mxu1 %v1801_v48 }
  0xb0   : > { %665 = vmatpush1.msra.mxu0 %v242_v49  ;;  %1346 = vmatpush3.msra.mxu1 %v244_v50  ;;  %v341_v49 = vld [vmem:[#allocation5 + $0x488] sm:$0xff]  ;;  %v340_v50 = vld [vmem:[#allocation5 + $0x480] sm:$0xff] }
  0xb1   : > { %515 = vmatmul.mubr.f32.gmra.mxu0 %v1808_v51  ;;  %628 = vmatmul.mubr.f32.gmra.mxu1 %v1808_v51 }
  0xb2   : > { %666 = vmatprep.subr.mxu0 %v236_v52  ;;  %1347 = vmatprep.subr.mxu1 %v349_v53  ;;  %v334_v52 = vld [vmem:[#allocation5 + $0x450] sm:$0xff]  ;;  %v333_v53 = vld [vmem:[#allocation5 + $0x448] sm:$0xff] }
  0xb3   : > { %667 = vmatpush1.msra.mxu0 %v235_v54  ;;  %1348 = vmatpush3.msra.mxu1 %v237_v55  ;;  %v327_v54 = vld [vmem:[#allocation5 + $0x418] sm:$0xff]  ;;  %v326_v55 = vld [vmem:[#allocation5 + $0x410] sm:$0xff] }
  0xb4   : > { %668 = vmatprep.subr.mxu0 %v229_v56  ;;  %1349 = vmatprep.subr.mxu1 %v342_v57  ;;  %v320_v56 = vld [vmem:[#allocation5 + $0x3e0] sm:$0xff]  ;;  %v319_v57 = vld [vmem:[#allocation5 + $0x3d8] sm:$0xff] }
  0xb5   : > { %902 = vrot.lane.b32.xlu1 %v1801_v48, %s1583_s15  ;;  %900 = vrot.lane.b32.xlu0 %v1808_v51, %s1583_s15 }
  0xb6   : > { %520 = vmatprep.mubr.f32.mxu0 %v1815_v58  ;;  %633 = vmatprep.mubr.f32.mxu1 %v1815_v58 }
  0xb7   : > { %669 = vmatpush1.msra.mxu0 %v228_v59  ;;  %1350 = vmatpush3.msra.mxu1 %v230_v60  ;;  %v313_v59 = vld [vmem:[#allocation5 + $0x3a8] sm:$0xff]  ;;  %v312_v60 = vld [vmem:[#allocation5 + $0x3a0] sm:$0xff] }
  0xb8   : > { %521 = vmatmul.mubr.f32.gmra.mxu0 %v1822_v61  ;;  %634 = vmatmul.mubr.f32.gmra.mxu1 %v1822_v61 }
  0xb9   : > { %670 = vmatprep.subr.mxu0 %v222_v62  ;;  %1351 = vmatprep.subr.mxu1 %v335_v0 }
  0xba   : > { %671 = vmatpush1.msra.mxu0 %v221_v2  ;;  %1352 = vmatpush3.msra.mxu1 %v223_v3 }
  0xbb   : > { %672 = vmatprep.subr.mxu0 %v215_v4  ;;  %1353 = vmatprep.subr.mxu1 %v328_v5 }
  0xbc   : > { %906 = vrot.lane.b32.xlu1 %v1815_v58, %s1583_s15  ;;  %904 = vrot.lane.b32.xlu0 %v1822_v61, %s1583_s15 }
  0xbd   : > { %526 = vmatprep.mubr.f32.mxu0 %v1829_v6  ;;  %639 = vmatprep.mubr.f32.mxu1 %v1829_v6 }
  0xbe   : > { %673 = vmatpush1.msra.mxu0 %v214_v7  ;;  %1354 = vmatpush3.msra.mxu1 %v216_v10 }
  0xbf   : > { %527 = vmatmul.mubr.f32.gmra.mxu0 %v1836_v11  ;;  %640 = vmatmul.mubr.f32.gmra.mxu1 %v1836_v11 }
  0xc0   : > { %674 = vmatprep.subr.mxu0 %v208_v12  ;;  %1355 = vmatprep.subr.mxu1 %v321_v13 }
  0xc1   : > { %675 = vmatpush1.msra.mxu0 %v207_v14  ;;  %1356 = vmatpush3.msra.mxu1 %v209_v15 }
  0xc2   : > { %676 = vmatprep.subr.mxu0 %v201_v16  ;;  %1357 = vmatprep.subr.mxu1 %v314_v17 }
  0xc3   : > { %910 = vrot.lane.b32.xlu1 %v1829_v6, %s1583_s15  ;;  %908 = vrot.lane.b32.xlu0 %v1836_v11, %s1583_s15 }
  0xc4   : > { %677 = vmatpush1.msra.mxu0 %v200_v19  ;;  %1358 = vmatpush3.msra.mxu1 %v202_v20 }
  0xc5   : > { %823 = vmatprep.mubr.f32.mxu1 %v1735_v63  ;;  %678 = vmatprep.subr.mxu0 %v418_v22 }
  0xc6   : > { %824 = vmatmul.mubr.f32.vlgmr.msra.gmra.mxu1 %v1738_v1  ;;  %679 = vmatpush2.msra.mxu0 %v417_v23 }
  0xc7   : > { %680 = vmatprep.subr.mxu0 %v411_v24  ;;  %939 = vrot.lane.b32.xlu1 %v1735_v63, %s1584_s17 }
  0xc8   : > { %937 = vrot.lane.b32.xlu0 %v1738_v1, %s1584_s17  ;;  %681 = vmatpush2.msra.mxu0 %v410_v25 }
  0xc9   : > { %828 = vmatprep.mubr.f32.mxu1 %v1748_v9  ;;  %682 = vmatprep.subr.mxu0 %v404_v26 }
  0xca   : > { %829 = vmatmul.mubr.f32.gmra.mxu1 %v1745_v8  ;;  %683 = vmatpush2.msra.mxu0 %v403_v27 }
  0xcb   : > { %684 = vmatprep.subr.mxu0 %v397_v29  ;;  %947 = vrot.lane.b32.xlu1 %v1759_v18, %s1584_s17 }
  0xcc   : > { %943 = vrot.lane.b32.xlu0 %v1748_v9, %s1584_s17  ;;  %685 = vmatpush2.msra.mxu0 %v396_v30 }
  0xcd   : > { %833 = vmatprep.mubr.f32.mxu1 %v1759_v18  ;;  %686 = vmatprep.subr.mxu0 %v390_v32 }
  0xce   : > { %834 = vmatmul.mubr.f32.gmra.mxu1 %v1766_v21  ;;  %687 = vmatpush2.msra.mxu0 %v389_v33 }
  0xcf   : > { %688 = vmatprep.subr.mxu0 %v383_v34  ;;  %955 = vrot.lane.b32.xlu1 %v1787_v38, %s1584_s17 }
  0xd0   : > { %951 = vrot.lane.b32.xlu0 %v1773_v28, %s1584_s17  ;;  %689 = vmatpush2.msra.mxu0 %v382_v35 }
  0xd1   : > { %838 = vmatprep.mubr.f32.mxu1 %v1773_v28  ;;  %690 = vmatprep.subr.mxu0 %v376_v36 }
  0xd2   : > { %839 = vmatmul.mubr.f32.gmra.mxu1 %v1780_v31  ;;  %691 = vmatpush2.msra.mxu0 %v375_v37 }
  0xd3   : > { %692 = vmatprep.subr.mxu0 %v369_v39  ;;  %963 = vrot.lane.b32.xlu1 %v1815_v58, %s1584_s17 }
  0xd4   : > { %959 = vrot.lane.b32.xlu0 %v1801_v48, %s1584_s17  ;;  %693 = vmatpush2.msra.mxu0 %v368_v40 }
  0xd5   : > { %843 = vmatprep.mubr.f32.mxu1 %v1787_v38  ;;  %694 = vmatprep.subr.mxu0 %v362_v42 }
  0xd6   : > { %844 = vmatmul.mubr.f32.gmra.mxu1 %v1794_v41  ;;  %695 = vmatpush2.msra.mxu0 %v361_v43 }
  0xd7   : > { %696 = vmatprep.subr.mxu0 %v355_v44  ;;  %1002 = vrot.lane.b32.xlu1 %v1738_v1, %s1585_s8 }
  0xd8   : > { %967 = vrot.lane.b32.xlu0 %v1829_v6, %s1584_s17  ;;  %697 = vmatpush2.msra.mxu0 %v354_v45 }
  0xd9   : > { %848 = vmatprep.mubr.f32.mxu1 %v1801_v48  ;;  %698 = vmatprep.subr.mxu0 %v348_v46 }
  0xda   : > { %849 = vmatmul.mubr.f32.gmra.mxu1 %v1808_v51  ;;  %699 = vmatpush2.msra.mxu0 %v347_v47 }
  0xdb   : > { %700 = vmatprep.subr.mxu0 %v341_v49  ;;  %1006 = vrot.lane.b32.xlu1 %v1745_v8, %s1585_s8 }
  0xdc   : > { %1004 = vrot.lane.b32.xlu0 %v1735_v63, %s1585_s8  ;;  %701 = vmatpush2.msra.mxu0 %v340_v50 }
  0xdd   : > { %853 = vmatprep.mubr.f32.mxu1 %v1815_v58  ;;  %702 = vmatprep.subr.mxu0 %v334_v52 }
  0xde   : > { %854 = vmatmul.mubr.f32.gmra.mxu1 %v1822_v61  ;;  %703 = vmatpush2.msra.mxu0 %v333_v53 }
  0xdf   : > { %704 = vmatprep.subr.mxu0 %v327_v54  ;;  %1010 = vrot.lane.b32.xlu1 %v1766_v21, %s1585_s8 }
  0xe0   : > { %1008 = vrot.lane.b32.xlu0 %v1748_v9, %s1585_s8  ;;  %705 = vmatpush2.msra.mxu0 %v326_v55 }
  0xe1   : > { %858 = vmatprep.mubr.f32.mxu1 %v1829_v6  ;;  %706 = vmatprep.subr.mxu0 %v320_v56 }
  0xe2   : > { %859 = vmatmul.mubr.f32.gmra.mxu1 %v1836_v11  ;;  %707 = vmatpush2.msra.mxu0 %v319_v57 }
  0xe3   : > { %708 = vmatprep.subr.mxu0 %v313_v59  ;;  %1014 = vrot.lane.b32.xlu1 %v1780_v31, %s1585_s8 }
  0xe4   : > { %1012 = vrot.lane.b32.xlu0 %v1759_v18, %s1585_s8  ;;  %709 = vmatpush2.msra.mxu0 %v312_v60 }
  0xe5   : > { %710 = vmatprep.mubr.f32.mxu0 %v1735_v63 }
  0xe6   : > { %711 = vmatmul.mubr.f32.vlgmr.msra.gmra.mxu0 %v1738_v1 }
  0xe7   : > { %1018 = vrot.lane.b32.xlu1 %v1794_v41, %s1585_s8  ;;  %716 = vmatprep.mubr.f32.mxu0 %v1748_v9 }
  0xe8   : > { %1016 = vrot.lane.b32.xlu0 %v1773_v28, %s1585_s8 }
  0xea   : > { %717 = vmatmul.mubr.f32.gmra.mxu0 %v1745_v8 }
  0xeb   : > { %1022 = vrot.lane.b32.xlu1 %v1808_v51, %s1585_s8  ;;  %722 = vmatprep.mubr.f32.mxu0 %v1759_v18 }
  0xec   : > { %1020 = vrot.lane.b32.xlu0 %v1787_v38, %s1585_s8 }
  0xee   : > { %723 = vmatmul.mubr.f32.gmra.mxu0 %v1766_v21 }
  0xef   : > { %1026 = vrot.lane.b32.xlu1 %v1822_v61, %s1585_s8  ;;  %728 = vmatprep.mubr.f32.mxu0 %v1773_v28 }
  0xf0   : > { %1024 = vrot.lane.b32.xlu0 %v1801_v48, %s1585_s8 }
  0xf2   : > { %729 = vmatmul.mubr.f32.gmra.mxu0 %v1780_v31 }
  0xf3   : > { %1030 = vrot.lane.b32.xlu1 %v1836_v11, %s1585_s8  ;;  %734 = vmatprep.mubr.f32.mxu0 %v1787_v38 }
  0xf4   : > { %1028 = vrot.lane.b32.xlu0 %v1815_v58, %s1585_s8 }
  0xf6   : > { %735 = vmatmul.mubr.f32.gmra.mxu0 %v1794_v41 }
  0xf7   : > { %941 = vrot.lane.b32.xlu1 %v1745_v8, %s1584_s17  ;;  %740 = vmatprep.mubr.f32.mxu0 %v1801_v48 }
  0xf8   : > { %1032 = vrot.lane.b32.xlu0 %v1829_v6, %s1585_s8 }
  0xfa   : > { %741 = vmatmul.mubr.f32.gmra.mxu0 %v1808_v51 }
  0xfb   : > { %746 = vmatprep.mubr.f32.mxu0 %v1815_v58  ;;  %949 = vrot.lane.b32.xlu1 %v1780_v31, %s1584_s17 }
  0xfc   : > { %945 = vrot.lane.b32.xlu0 %v1766_v21, %s1584_s17 }
  0xfe   : > { %747 = vmatmul.mubr.f32.gmra.mxu0 %v1822_v61 }
  0xff   : > { %752 = vmatprep.mubr.f32.mxu0 %v1829_v6  ;;  %957 = vrot.lane.b32.xlu1 %v1808_v51, %s1584_s17 }
 0x100   : > { %953 = vrot.lane.b32.xlu0 %v1794_v41, %s1584_s17 }
 0x102   : > { %753 = vmatmul.mubr.f32.gmra.mxu0 %v1836_v11 }
 0x103   : > { %965 = vrot.lane.b32.xlu1 %v1836_v11, %s1584_s17 }
 0x104   : > { %961 = vrot.lane.b32.xlu0 %v1822_v61, %s1584_s17  ;;  %v1942_v63 = vpop.permute.xlu1 %884  ;;  %v881_v1 = vpop.permute.xlu0 %880 }
 0x10b   : > { %v1944_v8 = vpop.permute.xlu1 %886  ;;  %v883_v9 = vpop.permute.xlu0 %882 }
 0x10c   : > { %v913_v30 = vsel %vm912_vm1, %v881_v1, %v883_v9  ;;  %v914_v57 = vsel %vm912_vm1, %v1942_v63, %v1944_v8 }
 0x112   : > { %v1946_v21 = vpop.permute.xlu1 %890  ;;  %v1948_v31 = vpop.permute.xlu0 %888 }
 0x119   : > { %v1950_v51 = vpop.permute.xlu1 %894  ;;  %v1952_v41 = vpop.permute.xlu0 %892 }
 0x120   : > { %v1954_v62 = vpop.permute.xlu1 %898  ;;  %v1956_v0 = vpop.permute.xlu0 %896 }
 0x127   : > { %v1958_v2 = vpop.permute.xlu1 %902  ;;  %v1960_v61 = vpop.permute.xlu0 %900 }
 0x12e   : > { %v1962_v3 = vpop.permute.xlu1 %906  ;;  %v1964_v4 = vpop.permute.xlu0 %904 }
 0x135   : > { %v1966_v5 = vpop.permute.xlu1 %910  ;;  %v1968_v7 = vpop.permute.xlu0 %908 }
 0x139   : > { %v940_v10 = vpop.permute.xlu1 %939 }
 0x13a   : > { %v938_v11 = vpop.permute.xlu0 %937  ;;  %v1971_v12 = vsel %vm969_vm0, %v940_v10, %v883_v9 }
 0x13b   : > { %v970_v33 = vsel %vm969_vm0, %v938_v11, %v940_v10  ;;  %v1059_v36 = vsel %vm912_vm1, %v883_v9, %v938_v11 }
 0x13d   : > { %v1973_v13 = vpop.permute.xlu1 %947 }
 0x13e   : > { %v1975_v14 = vpop.permute.xlu0 %943  ;;  %v1980_v15 = vsel %vm969_vm0, %v1973_v13, %v1946_v21 }
 0x141   : > { %v1982_v16 = vpop.permute.xlu1 %955 }
 0x142   : > { %v1984_v17 = vpop.permute.xlu0 %951  ;;  %v1989_v19 = vsel %vm969_vm0, %v1982_v16, %v1954_v62 }
 0x143   : > { %v1994_v20 = vsel %vm969_vm0, %v1984_v17, %v1950_v51 }
 0x145   : > { %v1996_v22 = vpop.permute.xlu1 %963 }
 0x146   : > { %v1998_v23 = vpop.permute.xlu0 %959  ;;  %v2003_v24 = vsel %vm969_vm0, %v1996_v22, %v1962_v3 }
 0x147   : > { %v2008_v25 = vsel %vm969_vm0, %v1998_v23, %v1958_v2 }
 0x149   : > { %v1003_v26 = vpop.permute.xlu1 %1002 }
 0x14a   : > { %v2010_v27 = vpop.permute.xlu0 %967 }
 0x14b   : > { %v2016_v29 = vsel %vm969_vm0, %v2010_v27, %v1966_v5 }
 0x14d   : > { %v1007_v32 = vpop.permute.xlu1 %1006 }
 0x14e   : > { %v2020_v34 = vpop.permute.xlu0 %1004  ;;  %v486_v35 = vpop.f32.mrf.mxu0 }
 0x14f   : > { %v1035_v37 = vsel %vm1034_vm2, %v1003_v26, %v2020_v34  ;;  %v1099_v39 = vmul.f32 %v913_v30, %v486_v35  ;;  %v599_v40 = vpop.f32.mrf.mxu1  ;;  %v2027_v42 = vsel %vm1034_vm2, %v2020_v34, %v940_v10  ;;  %v915_v35 = vsel %vm912_vm1, %v1948_v31, %v1946_v21 }
 0x150   : > { %v1101_v43 = vmul.f32 %v970_v33, %v599_v40  ;;  %v488_v44 = vpop.f32.mrf.mxu0  ;;  %v1067_v45 = vsel %vm969_vm0, %v940_v10, %v1035_v37 }
 0x151   : > { %v1011_v46 = vpop.permute.xlu1 %1010  ;;  %1155 = vst [vmem:[%s2030_s19] sm:$0xff] %v1099_v39  ;;  %v1100_v47 = vmul.f32 %v1059_v36, %v488_v44  ;;  %v601_v49 = vpop.f32.mrf.mxu1 }
 0x152   : > { %v2033_v50 = vpop.permute.xlu0 %1008  ;;  %1157 = vst [vmem:[%s2030_s19 + $0x10] sm:$0xff] %v1101_v43  ;;  %v1102_v52 = vmul.f32 %v1067_v45, %v601_v49 }
 0x153   : > { %v1036_v53 = vsel %vm1034_vm2, %v1007_v32, %v2033_v50  ;;  %1156 = vst [vmem:[%s2030_s19 + $0x8] sm:$0xff] %v1100_v47  ;;  %v2042_v54 = vsel %vm1034_vm2, %v2033_v50, %v1975_v14 }
 0x154   : > { %1158 = vst [vmem:[%s2030_s19 + $0x18] sm:$0xff] %v1102_v52  ;;  %v1068_v9 = vsel %vm969_vm0, %v1975_v14, %v1036_v53 }
 0x155   : > { %v1015_v55 = vpop.permute.xlu1 %1014  ;;  %v492_v56 = vpop.f32.mrf.mxu0 }
 0x156   : > { %v2048_v59 = vpop.permute.xlu0 %1012  ;;  %v1106_v60 = vmul.f32 %v914_v57, %v492_v56  ;;  %v605_v1 = vpop.f32.mrf.mxu1  ;;  %v916_v56 = vsel %vm912_vm1, %v1952_v41, %v1950_v51 }
 0x157   : > { %v2055_v10 = vsel %vm1034_vm2, %v2048_v59, %v1973_v13  ;;  %v494_v11 = vpop.f32.mrf.mxu0  ;;  %v1037_v63 = vsel %vm1034_vm2, %v1011_v46, %v2048_v59 }
 0x158   : > { %1162 = vst [vmem:[%s2030_s19 + $0x38] sm:$0xff] %v1106_v60  ;;  %v607_v26 = vpop.f32.mrf.mxu1  ;;  %v1069_v44 = vsel %vm969_vm0, %v1973_v13, %v1037_v63 }
 0x159   : > { %v1019_v30 = vpop.permute.xlu1 %1018  ;;  %v1109_v32 = vmul.f32 %v1068_v9, %v607_v26 }
 0x15a   : > { %v2060_v33 = vpop.permute.xlu0 %1016 }
 0x15b   : > { %1165 = vst [vmem:[%s2030_s19 + $0x50] sm:$0xff] %v1109_v32  ;;  %v2069_v36 = vsel %vm1034_vm2, %v2060_v33, %v1984_v17  ;;  %v1038_v52 = vsel %vm1034_vm2, %v1015_v55, %v2060_v33 }
 0x15c   : > { %v498_v37 = vpop.f32.mrf.mxu0  ;;  %v611_v39 = vpop.f32.mrf.mxu1  ;;  %v1070_v55 = vsel %vm969_vm0, %v1984_v17, %v1038_v52 }
 0x15d   : > { %v1023_v40 = vpop.permute.xlu1 %1022  ;;  %v1113_v43 = vmul.f32 %v915_v35, %v498_v37 }
 0x15e   : > { %v2073_v45 = vpop.permute.xlu0 %1020  ;;  %v500_v46 = vpop.f32.mrf.mxu0 }
 0x15f   : > { %2331 = vst [vmem:[#allocation11_spill] sm:$0xff] %v2073_v45  ;;  %1169 = vst [vmem:[%s2030_s19 + $0x70] sm:$0xff] %v1113_v43  ;;  %v613_v47 = vpop.f32.mrf.mxu1  ;;  %v2079_v31 = vsel %vm1034_vm2, %v2073_v45, %v1982_v16 }
 0x160   : > { %2332 = vst [vmem:[#allocation12_spill] sm:$0xff] %v2079_v31  ;;  %v1116_v49 = vmul.f32 %v1069_v44, %v613_v47  ;;  %v1039_v47 = vsel %vm1034_vm2, %v1019_v30, %v2073_v45 }
 0x161   : > { %v2083_v53 = vpop.permute.xlu1 %1026  ;;  %v1071_v31 = vsel %vm969_vm0, %v1982_v16, %v1039_v47 }
 0x162   : > { %v2088_v57 = vpop.permute.xlu0 %1024  ;;  %1172 = vst [vmem:[%s2030_s19 + $0x88] sm:$0xff] %v1116_v49  ;;  %v917_v49 = vsel %vm912_vm1, %v1956_v0, %v1954_v62 }
 0x163   : > { %v504_v60 = vpop.f32.mrf.mxu0  ;;  %v617_v9 = vpop.f32.mrf.mxu1  ;;  %v2094_v26 = vsel %vm1034_vm2, %v2088_v57, %v1998_v23  ;;  %v1040_v47 = vsel %vm1034_vm2, %v1023_v40, %v2088_v57 }
 0x164   : > { %2333 = vst [vmem:[#allocation13_spill] sm:$0xff] %v2094_v26  ;;  %v1120_v32 = vmul.f32 %v916_v56, %v504_v60 }
 0x165   : > { %v2098_v63 = vpop.permute.xlu1 %1030  ;;  %v506_v35 = vpop.f32.mrf.mxu0 }
 0x166   : > { %v2100_v37 = vpop.permute.xlu0 %1028  ;;  %1176 = vst [vmem:[%s2030_s19 + $0xa8] sm:$0xff] %v1120_v32  ;;  %v619_v41 = vpop.f32.mrf.mxu1 }
 0x167   : > { %v1123_v43 = vmul.f32 %v1070_v55, %v619_v41  ;;  %v2106_v44 = vsel %vm1034_vm2, %v2100_v37, %v1996_v22 }
 0x168   : > { %2334 = vst [vmem:[#allocation14_spill] sm:$0xff] %v2106_v44 }
 0x169   : > { %v942_v52 = vpop.permute.xlu1 %941  ;;  %1179 = vst [vmem:[%s2030_s19 + $0xc0] sm:$0xff] %v1123_v43 }
 0x16a   : > { %v971_v56 = vsel %vm969_vm0, %v942_v52, %v1975_v14  ;;  %v2116_v60 = vpop.permute.xlu0 %1032  ;;  %v1060_v32 = vsel %vm912_vm1, %v1944_v8, %v942_v52  ;;  %v510_v55 = vpop.f32.mrf.mxu0 }
 0x16b   : > { %v1108_v41 = vmul.f32 %v971_v56, %v605_v1  ;;  %v1107_v44 = vmul.f32 %v1060_v32, %v494_v11  ;;  %v1127_v30 = vmul.f32 %v917_v49, %v510_v55  ;;  %v623_v26 = vpop.f32.mrf.mxu1  ;;  %v2125_v43 = vsel %vm1034_vm2, %v2116_v60, %v2010_v27 }
 0x16c   : > { %v512_v0 = vpop.f32.mrf.mxu0  ;;  %2335 = vst [vmem:[#allocation15_spill] sm:$0xff] %v2125_v43  ;;  %v918_v11 = vsel %vm912_vm1, %v1960_v61, %v1958_v2 }
 0x16d   : > { %1164 = vst [vmem:[%s2030_s19 + $0x48] sm:$0xff] %v1108_v41  ;;  %1163 = vst [vmem:[%s2030_s19 + $0x40] sm:$0xff] %v1107_v44  ;;  %v950_v45 = vpop.permute.xlu1 %949  ;;  %v625_v1 = vpop.f32.mrf.mxu1 }
 0x16e   : > { %1183 = vst [vmem:[%s2030_s19 + $0xe0] sm:$0xff] %v1127_v30  ;;  %v946_v49 = vpop.permute.xlu0 %945  ;;  %v973_v52 = vsel %vm969_vm0, %v950_v45, %v1984_v17  ;;  %v1062_v44 = vsel %vm912_vm1, %v1950_v51, %v950_v45  ;;  %v1130_v56 = vmul.f32 %v1071_v31, %v625_v1 }
 0x16f   : > { %v972_v32 = vsel %vm969_vm0, %v946_v49, %v1973_v13  ;;  %v1061_v55 = vsel %vm912_vm1, %v1946_v21, %v946_v49  ;;  %v1122_v61 = vmul.f32 %v973_v52, %v617_v9  ;;  %v1121_v41 = vmul.f32 %v1062_v44, %v506_v35 }
 0x170   : > { %v1115_v30 = vmul.f32 %v972_v32, %v611_v39  ;;  %v1114_v40 = vmul.f32 %v1061_v55, %v500_v46  ;;  %1186 = vst [vmem:[%s2030_s19 + $0xf8] sm:$0xff] %v1130_v56  ;;  %v1072_v21 = vsel %vm969_vm0, %v1998_v23, %v1040_v47 }
 0x171   : > { %1178 = vst [vmem:[%s2030_s19 + $0xb8] sm:$0xff] %v1122_v61  ;;  %1177 = vst [vmem:[%s2030_s19 + $0xb0] sm:$0xff] %v1121_v41  ;;  %v516_v43 = vpop.f32.mrf.mxu0  ;;  %v629_v17 = vpop.f32.mrf.mxu1 }
 0x172   : > { %1171 = vst [vmem:[%s2030_s19 + $0x80] sm:$0xff] %v1115_v30  ;;  %1170 = vst [vmem:[%s2030_s19 + $0x78] sm:$0xff] %v1114_v40  ;;  %v954_v51 = vpop.permute.xlu0 %953  ;;  %v1134_v45 = vmul.f32 %v918_v11, %v516_v43  ;;  %v958_v31 = vpop.permute.xlu1 %957  ;;  %v1042_v30 = vsel %vm1034_vm2, %v2098_v63, %v2116_v60 }
 0x173   : > { %v974_v13 = vsel %vm969_vm0, %v954_v51, %v1982_v16  ;;  %v1063_v39 = vsel %vm912_vm1, %v1954_v62, %v954_v51  ;;  %v975_v46 = vsel %vm969_vm0, %v958_v31, %v1998_v23  ;;  %v518_v9 = vpop.f32.mrf.mxu0  ;;  %v1064_v35 = vsel %vm912_vm1, %v1958_v2, %v958_v31  ;;  %v631_v49 = vpop.f32.mrf.mxu1 }
 0x174   : > { %v1129_v43 = vmul.f32 %v974_v13, %v623_v26  ;;  %v1128_v1 = vmul.f32 %v1063_v39, %v512_v0  ;;  %1190 = vst [vmem:[%s2030_s19 + $0x118] sm:$0xff] %v1134_v45  ;;  %v1136_v11 = vmul.f32 %v975_v46, %v629_v17  ;;  %v1135_v47 = vmul.f32 %v1064_v35, %v518_v9 }
 0x175   : > { %v1041_v16 = vsel %vm1034_vm2, %v2083_v53, %v2100_v37  ;;  %v1137_v52 = vmul.f32 %v1072_v21, %v631_v49  ;;  %v919_v62 = vsel %vm912_vm1, %v1964_v4, %v1962_v3  ;;  %v1074_v63 = vsel %vm969_vm0, %v2010_v27, %v1042_v30 }
 0x176   : > { %1185 = vst [vmem:[%s2030_s19 + $0xf0] sm:$0xff] %v1129_v43  ;;  %1184 = vst [vmem:[%s2030_s19 + $0xe8] sm:$0xff] %v1128_v1  ;;  %v962_v2 = vpop.permute.xlu0 %961  ;;  %v1073_v44 = vsel %vm969_vm0, %v1996_v22, %v1041_v16  ;;  %v966_v40 = vpop.permute.xlu1 %965 }
 0x177   : > { %1192 = vst [vmem:[%s2030_s19 + $0x128] sm:$0xff] %v1136_v11  ;;  %1191 = vst [vmem:[%s2030_s19 + $0x120] sm:$0xff] %v1135_v47  ;;  %v976_v23 = vsel %vm969_vm0, %v962_v2, %v1996_v22  ;;  %v1065_v0 = vsel %vm912_vm1, %v1962_v3, %v962_v2  ;;  %v920_v3 = vsel %vm912_vm1, %v1968_v7, %v1966_v5 }
 0x178   : > { %1193 = vst [vmem:[%s2030_s19 + $0x130] sm:$0xff] %v1137_v52  ;;  %v522_v26 = vpop.f32.mrf.mxu0  ;;  %v635_v53 = vpop.f32.mrf.mxu1  ;;  %v977_v22 = vsel %vm969_vm0, %v966_v40, %v2010_v27  ;;  %v1066_v45 = vsel %vm912_vm1, %v1966_v5, %v966_v40  ;;  %v1451_v5 = vld [vmem:[%s1724_s24 + $0x8] sm:$0xff]  ;;  %v1084_v47 = vsel %vm969_vm0, %v1975_v14, %v1944_v8  ;;  %v1452_v52 = vld [vmem:[%s1724_s24 + $0x18] sm:$0xff] }
 0x179   : > { %v1141_v56 = vmul.f32 %v919_v62, %v522_v26  ;;  %v1143_v32 = vmul.f32 %v976_v23, %v635_v53  ;;  %v1091_v27 = vsel %vm912_vm1, %v1971_v12, %v1451_v5  ;;  %v1092_v62 = vsel %vm912_vm1, %v1084_v47, %v1452_v52  ;;  %v2336_v5 = vld [vmem:[#allocation11_spill] sm:$0xff] }
 0x17a   : > { %v524_v55 = vpop.f32.mrf.mxu0  ;;  %v637_v61 = vpop.f32.mrf.mxu1  ;;  %v1093_v12 = vsel %vm912_vm1, %v1980_v15, %v1759_v18  ;;  %v1095_v18 = vsel %vm912_vm1, %v1989_v19, %v1787_v38  ;;  %v1097_v38 = vsel %vm912_vm1, %v2003_v24, %v1815_v58 }
 0x17b   : > { %1197 = vst [vmem:[%s2030_s19 + $0x150] sm:$0xff] %v1141_v56  ;;  %1199 = vst [vmem:[%s2030_s19 + $0x160] sm:$0xff] %v1143_v32  ;;  %v1142_v4 = vmul.f32 %v1065_v0, %v524_v55  ;;  %v1144_v41 = vmul.f32 %v1073_v44, %v637_v61  ;;  %v1094_v56 = vsel %vm912_vm1, %v1994_v20, %v1773_v28 }
 0x17c   : > { %v1096_v28 = vsel %vm912_vm1, %v2008_v25, %v1801_v48  ;;  %v1098_v48 = vsel %vm912_vm1, %v2016_v29, %v1829_v6 }
 0x17d   : > { %1198 = vst [vmem:[%s2030_s19 + $0x158] sm:$0xff] %v1142_v4  ;;  %1200 = vst [vmem:[%s2030_s19 + $0x168] sm:$0xff] %v1144_v41 }
 0x17f   : > { %v528_v17 = vpop.f32.mrf.mxu0  ;;  %v641_v51 = vpop.f32.mrf.mxu1 }
 0x180   : > { %v1148_v31 = vmul.f32 %v920_v3, %v528_v17  ;;  %v1150_v21 = vmul.f32 %v977_v22, %v641_v51 }
 0x181   : > { %v530_v13 = vpop.f32.mrf.mxu0  ;;  %v643_v39 = vpop.f32.mrf.mxu1 }
 0x182   : > { %1204 = vst [vmem:[%s2030_s19 + $0x188] sm:$0xff] %v1148_v31  ;;  %1206 = vst [vmem:[%s2030_s19 + $0x198] sm:$0xff] %v1150_v21  ;;  %v1149_v7 = vmul.f32 %v1066_v45, %v530_v13  ;;  %v1151_v46 = vmul.f32 %v1074_v63, %v643_v39 }
 0x184   : > { %1205 = vst [vmem:[%s2030_s19 + $0x190] sm:$0xff] %v1149_v7  ;;  %1207 = vst [vmem:[%s2030_s19 + $0x1a0] sm:$0xff] %v1151_v46 }
 0x186   : > { %v1359_v9 = vpop.f32.mrf.mxu1 }
 0x188   : > { %v1360_v35 = vpop.f32.mrf.mxu1 }
 0x189   : > { %v1361_v43 = vadd.f32 %v1360_v35, %v1359_v9 }
 0x18a   : > { %v1362_v1 = vpop.f32.mrf.mxu1 }
 0x18b   : > { %v1105_v11 = vmul.f32 %v1361_v43, %v1091_v27 }
 0x18c   : > { %v1363_v49 = vpop.f32.mrf.mxu1 }
 0x18d   : > { %1161 = vst [vmem:[%s2030_s19 + $0x30] sm:$0xff] %v1105_v11  ;;  %v1364_v16 = vadd.f32 %v1363_v49, %v1362_v1  ;;  %v2338_v49 = vld [vmem:[#allocation13_spill] sm:$0xff] }
 0x18e   : > { %v1365_v2 = vpop.f32.mrf.mxu1 }
 0x18f   : > { %v1112_v23 = vmul.f32 %v1364_v16, %v1092_v62 }
 0x190   : > { %v1366_v26 = vpop.f32.mrf.mxu1 }
 0x191   : > { %1168 = vst [vmem:[%s2030_s19 + $0x68] sm:$0xff] %v1112_v23  ;;  %v1367_v53 = vadd.f32 %v1366_v26, %v1365_v2  ;;  %v2339_v2 = vld [vmem:[#allocation14_spill] sm:$0xff] }
 0x192   : > { %v1368_v0 = vpop.f32.mrf.mxu1 }
 0x193   : > { %v1119_v44 = vmul.f32 %v1367_v53, %v1093_v12 }
 0x194   : > { %v1369_v8 = vpop.f32.mrf.mxu1 }
 0x195   : > { %1175 = vst [vmem:[%s2030_s19 + $0xa0] sm:$0xff] %v1119_v44  ;;  %v1370_v14 = vadd.f32 %v1369_v8, %v1368_v0 }
 0x196   : > { %v1371_v32 = vpop.f32.mrf.mxu1 }
 0x197   : > { %v1126_v55 = vmul.f32 %v1370_v14, %v1094_v56 }
 0x198   : > { %v1372_v61 = vpop.f32.mrf.mxu1 }
 0x199   : > { %1182 = vst [vmem:[%s2030_s19 + $0xd8] sm:$0xff] %v1126_v55  ;;  %v1373_v4 = vadd.f32 %v1372_v61, %v1371_v32 }
 0x19a   : > { %v1374_v15 = vpop.f32.mrf.mxu1 }
 0x19b   : > { %v1133_v41 = vmul.f32 %v1373_v4, %v1095_v18 }
 0x19c   : > { %v1375_v30 = vpop.f32.mrf.mxu1 }
 0x19d   : > { %1189 = vst [vmem:[%s2030_s19 + $0x110] sm:$0xff] %v1133_v41  ;;  %v1376_v40 = vadd.f32 %v1375_v30, %v1374_v15 }
 0x19e   : > { %v1377_v20 = vpop.f32.mrf.mxu1 }
 0x19f   : > { %v1140_v3 = vmul.f32 %v1376_v40, %v1096_v28 }
 0x1a0   : > { %v1378_v22 = vpop.f32.mrf.mxu1 }
 0x1a1   : > { %1196 = vst [vmem:[%s2030_s19 + $0x148] sm:$0xff] %v1140_v3  ;;  %v1379_v17 = vadd.f32 %v1378_v22, %v1377_v20 }
 0x1a2   : > { %v1380_v19 = vpop.f32.mrf.mxu1 }
 0x1a3   : > { %v1147_v51 = vmul.f32 %v1379_v17, %v1097_v38 }
 0x1a4   : > { %v1381_v45 = vpop.f32.mrf.mxu1 }
 0x1a5   : > { %1203 = vst [vmem:[%s2030_s19 + $0x180] sm:$0xff] %v1147_v51  ;;  %v1382_v63 = vadd.f32 %v1381_v45, %v1380_v19 }
 0x1a6   : > { %v712_v25 = vpop.f32.mrf.mxu0 }
 0x1a7   : > { %v1154_v31 = vmul.f32 %v1382_v63, %v1098_v48  ;;  %v1103_v21 = vmul.f32 %v2020_v34, %v712_v25 }
 0x1a8   : > { %v714_v13 = vpop.f32.mrf.mxu0 }
 0x1a9   : > { %1210 = vst [vmem:[%s2030_s19 + $0x1b8] sm:$0xff] %v1154_v31  ;;  %1159 = vst [vmem:[%s2030_s19 + $0x20] sm:$0xff] %v1103_v21  ;;  %v1104_v58 = vmul.f32 %v2027_v42, %v714_v13 }
 0x1aa   : > { %v718_v24 = vpop.f32.mrf.mxu0 }
 0x1ab   : > { %1160 = vst [vmem:[%s2030_s19 + $0x28] sm:$0xff] %v1104_v58  ;;  %v1110_v39 = vmul.f32 %v2033_v50, %v718_v24 }
 0x1ac   : > { %v720_v7 = vpop.f32.mrf.mxu0 }
 0x1ad   : > { %1166 = vst [vmem:[%s2030_s19 + $0x58] sm:$0xff] %v1110_v39  ;;  %v1111_v6 = vmul.f32 %v2042_v54, %v720_v7 }
 0x1ae   : > { %v724_v29 = vpop.f32.mrf.mxu0 }
 0x1af   : > { %1167 = vst [vmem:[%s2030_s19 + $0x60] sm:$0xff] %v1111_v6  ;;  %v1117_v34 = vmul.f32 %v2048_v59, %v724_v29 }
 0x1b0   : > { %v726_v46 = vpop.f32.mrf.mxu0 }
 0x1b1   : > { %1173 = vst [vmem:[%s2030_s19 + $0x90] sm:$0xff] %v1117_v34  ;;  %v1118_v42 = vmul.f32 %v2055_v10, %v726_v46  ;;  %v2337_v10 = vld [vmem:[#allocation12_spill] sm:$0xff] }
 0x1b2   : > { %v730_v9 = vpop.f32.mrf.mxu0 }
 0x1b3   : > { %1174 = vst [vmem:[%s2030_s19 + $0x98] sm:$0xff] %v1118_v42  ;;  %v1124_v50 = vmul.f32 %v2060_v33, %v730_v9 }
 0x1b4   : > { %v732_v35 = vpop.f32.mrf.mxu0 }
 0x1b5   : > { %1180 = vst [vmem:[%s2030_s19 + $0xc8] sm:$0xff] %v1124_v50  ;;  %v1125_v54 = vmul.f32 %v2069_v36, %v732_v35 }
 0x1b6   : > { %v736_v43 = vpop.f32.mrf.mxu0 }
 0x1b7   : > { %1181 = vst [vmem:[%s2030_s19 + $0xd0] sm:$0xff] %v1125_v54  ;;  %v1131_v59 = vmul.f32 %v2336_v5, %v736_v43 }
 0x1b8   : > { %v738_v27 = vpop.f32.mrf.mxu0 }
 0x1b9   : > { %1187 = vst [vmem:[%s2030_s19 + $0x100] sm:$0xff] %v1131_v59  ;;  %v1132_v1 = vmul.f32 %v2337_v10, %v738_v27 }
 0x1ba   : > { %v742_v11 = vpop.f32.mrf.mxu0 }
 0x1bb   : > { %1188 = vst [vmem:[%s2030_s19 + $0x108] sm:$0xff] %v1132_v1  ;;  %v1138_v33 = vmul.f32 %v2088_v57, %v742_v11 }
 0x1bc   : > { %v744_v47 = vpop.f32.mrf.mxu0 }
 0x1bd   : > { %1194 = vst [vmem:[%s2030_s19 + $0x138] sm:$0xff] %v1138_v33  ;;  %v1139_v36 = vmul.f32 %v2338_v49, %v744_v47 }
 0x1be   : > { %v748_v16 = vpop.f32.mrf.mxu0 }
 0x1bf   : > { %1195 = vst [vmem:[%s2030_s19 + $0x140] sm:$0xff] %v1139_v36  ;;  %v1145_v52 = vmul.f32 %v2100_v37, %v748_v16  ;;  %v2340_v37 = vld [vmem:[#allocation15_spill] sm:$0xff] }
 0x1c0   : > { %v750_v62 = vpop.f32.mrf.mxu0 }
 0x1c1   : > { %1201 = vst [vmem:[%s2030_s19 + $0x170] sm:$0xff] %v1145_v52  ;;  %v1146_v23 = vmul.f32 %v2339_v2, %v750_v62 }
 0x1c2   : > { %v754_v26 = vpop.f32.mrf.mxu0 }
 0x1c3   : > { %1202 = vst [vmem:[%s2030_s19 + $0x178] sm:$0xff] %v1146_v23  ;;  %v1152_v57 = vmul.f32 %v2116_v60, %v754_v26 }
 0x1c4   : > { %v756_v53 = vpop.f32.mrf.mxu0 }
 0x1c5   : > { %1208 = vst [vmem:[%s2030_s19 + $0x1a8] sm:$0xff] %v1152_v57  ;;  %v1153_v12 = vmul.f32 %v2340_v37, %v756_v53 }
 0x1c7   : > { %1209 = vst [vmem:[%s2030_s19 + $0x1b0] sm:$0xff] %v1153_v12 }
 0x1c8   : > { %1520 = shalt.err (!%p1517_p0)
}
 0x1c9   : > { %s1521_s7 = scalar_lea.hbm %s2264_s28, 7168  ;;  %s1525_s24 = scalar_lea.hbm %s2314_s2, 14336 }
 0x1ca   : > { %p1522_p5 = scmp.ne.s32.totalorder %s2264_s28, %s1521_s7  ;;  %p1526_p4 = scmp.lt.s32.totalorder %s2264_s28, %s2314_s2 }
 0x1cb   : > { %p1527_p6 = scmp.lt.s32.totalorder %s1525_s24, %s1521_s7 }
 0x1cc   : > { %p1523_p9 = pnand %p1522_p5, %p2341_p11 }
 0x1cd   : > { %p1528_p8 = por %p1527_p6, %p1526_p4 }
 0x1ce   : > { %p1524_p1 = pneg %p1523_p9 }
 0x1d0   : > { %p1529_p3 = pnand %p1528_p8, %p1524_p1 }
 0x1d2   : > { %1532 = shalt.err (!%p1529_p3)
}
 0x1d3   : > { %s1587_s8 = smov 896   ;;  %s1588_s18 = smov 56  }
 0x1d4   : > { %1391 = dma.vmem_to_hbm [thread:$0]  (%p2341_p11), %s2266_s25, 7168, %s2264_s28, %s1212_s13, %s1587_s8, %s1587_s8, %s1588_s18  }
 0x1d5 PF: > { %s1241_s19 = sand.u32 1, %s1563_s9   ;;  %p2342_p7 = scmp.ne.s32.totalorder %s2321_s16, 0 }
 0x1d6   : > { %p2343_p12 = scmp.ge.s32.totalorder %s1575_s12, 2  ;;  %s1242_s20 = scalar_lea.sflag [#allocation4], %s1241_s19 }
 0x1d8   : > { %p1402_p10 = pnand %p2343_p12, %p2342_p7 }
 0x1da   : > { %p1403_p2 = pneg %p1402_p10 }
 0x1dc   : > { %1558 = dma.done.wait (%p1403_p2), %s1242_s20, 7168  }
 0x1dd   : > { %1560 = vsyncadd (%p1403_p2), %s1242_s20, 4294960128  ;;  %p16_p13 = scmp.ge.s32.totalorder %s1658_s21, 4   ;;  %s2344_s9 = smov %s1567_s10 }
 0x1de   : > { %s2345_s10 = smov %s1571_s11  ;;  %s2346_s11 = smov %s1675_s29 }
 0x1df   : > { %s2347_s12 = smov %s1658_s21  ;;  %18 = sbr.rel (!%p16_p13) target bundleno = 6 (0x6), region = 77 }
 0x1e4   :  { %1247 = vsyncpa [#allocation3], 1 }
 0x1e5   :  { %1249 = vsyncpa [#allocation3 + $0x1], 1 }
 0x1e6   :  { %1250 = vsyncpa [#allocation6], 1 }
 0x1e7   :  { %1251 = vsyncpa [#allocation4], 1 }
 0x1e8   :  { %1253 = vsyncpa [#allocation4 + $0x1], 1 }

</bundles_post_ra>
